<compile_context>
chip_gen: v6e
topology: v6e:2x2x1
jax: 0.10.0
libtpu: 0.0.40
codegen_flags: <defaults>
</compile_context>

<pallas_src>
import functools

import jax
import jax.numpy as jnp
import numpy as np
from jax.experimental import pallas as pl
from jax.experimental.pallas import tpu as pltpu


# ----------------------------------------------------------------------------- kernels


def _stage1_kernel(x_ref, set_ref,
                   rb0_wf, rb0_bf, rb0_w2, rb0_b2,
                   rb1_w1, rb1_b1, rb1_w2, rb1_b2,
                   rb2_w1, rb2_b1, rb2_w2, rb2_b2,
                   gm1_wx, gm1_ws, gm1_b, gm2_w, gm2_b,
                   m4a_wg, m4a_bg,
                   gcat_ref, xmax_acc, *, n_valid):
    """Per-point encoder + per-batch max-pool accumulator + (last step) global head."""
    nt = pl.program_id(1)
    last = pl.num_programs(1) - 1
    H = rb0_w2.shape[0]

    def mm(w_ref, a):
        return jnp.dot(w_ref[...], a, preferred_element_type=jnp.float32)

    x = x_ref[0]                                                  # (Cin, tile_n)
    tile_n = x.shape[1]

    # ResidualMLP(6, H): fused [fc1 | shortcut] matmul, split along sublanes.
    t = mm(rb0_wf, x) + rb0_bf[...]                               # (2H, tile_n)
    h = jnp.maximum(mm(rb0_w2, jnp.maximum(t[:H], 0.0)) + rb0_b2[...] + t[H:], 0.0)

    # ResidualMLP(H, H) x2 -- identity shortcut.
    o = jnp.maximum(mm(rb1_w1, h) + rb1_b1[...], 0.0)
    h = jnp.maximum(mm(rb1_w2, o) + rb1_b2[...] + h, 0.0)

    o = jnp.maximum(mm(rb2_w1, h) + rb2_b1[...], 0.0)
    h = jnp.maximum(mm(rb2_w2, o) + rb2_b2[...] + h, 0.0)        # (H, tile_n)

    # Masked per-tile max over points (lanes); padded columns excluded.
    col = nt * tile_n + jax.lax.broadcasted_iota(jnp.int32, (H, tile_n), 1)
    tile_max = jnp.max(jnp.where(col < n_valid, h, -jnp.inf), axis=1, keepdims=True)

    @pl.when(nt == 0)
    def _():
        xmax_acc[...] = tile_max

    @pl.when(nt > 0)
    def _():
        xmax_acc[...] = jnp.maximum(xmax_acc[...], tile_max)

    # Head folded into the last reduction step: global MLP + the "global half"
    # (and biases) of mlp4 block-0's fc1/shortcut, packed as gcat = [gfc1 ; gsc].
    @pl.when(nt == last)
    def _():
        g = mm(gm1_wx, xmax_acc[...]) + mm(gm1_ws, set_ref[0]) + gm1_b[...]
        g = jnp.maximum(g, 0.0)
        g = jnp.maximum(mm(gm2_w, g) + gm2_b[...], 0.0)           # x_global (H, 1)
        gcat_ref[0] = mm(m4a_wg, g) + m4a_bg[...]                 # (2H, 1)


def _stage2_kernel(x_ref, gcat_ref,
                   rb0_wf, rb0_bf, rb0_w2, rb0_b2,
                   rb1_w1, rb1_b1, rb1_w2, rb1_b2,
                   rb2_w1, rb2_b1, rb2_w2, rb2_b2,
                   m4a_wx, m4a_w2, m4a_b2,
                   m4b_wf, m4b_bf, m4b_w2, m4b_b2,
                   m5a_wf, m5a_bf, m5a_w2, m5a_b2,
                   out_w, out_b,
                   out_ref):
    """Recompute encoder, then mlp4/mlp5 ResidualMLPs + output layer (lane-dense)."""
    H = rb0_w2.shape[0]
    Hh = m4b_w2.shape[0]
    Hq = m5a_w2.shape[0]

    def mm(w_ref, a):
        return jnp.dot(w_ref[...], a, preferred_element_type=jnp.float32)

    x = x_ref[0]                                                  # (Cin, tile_n)

    # Recompute per-point encoder (cheaper than a (B,N,H) feats HBM round trip).
    t = mm(rb0_wf, x) + rb0_bf[...]
    h = jnp.maximum(mm(rb0_w2, jnp.maximum(t[:H], 0.0)) + rb0_b2[...] + t[H:], 0.0)

    o = jnp.maximum(mm(rb1_w1, h) + rb1_b1[...], 0.0)
    h = jnp.maximum(mm(rb1_w2, o) + rb1_b2[...] + h, 0.0)

    o = jnp.maximum(mm(rb2_w1, h) + rb2_b1[...], 0.0)
    h = jnp.maximum(mm(rb2_w2, o) + rb2_b2[...] + h, 0.0)

    # mlp4 block 0: ResidualMLP(2H, H); concat split, global halves pre-folded in gcat.
    t = mm(m4a_wx, h) + gcat_ref[0]                               # (2H, tile_n)
    h = jnp.maximum(mm(m4a_w2, jnp.maximum(t[:H], 0.0)) + m4a_b2[...] + t[H:], 0.0)

    # mlp4 block 1: ResidualMLP(H, H//2) -- fused [fc1 | shortcut].
    t = mm(m4b_wf, h) + m4b_bf[...]
    h = jnp.maximum(mm(m4b_w2, jnp.maximum(t[:Hh], 0.0)) + m4b_b2[...] + t[Hh:], 0.0)

    # mlp5 block 0: ResidualMLP(H//2, H//4) -- fused [fc1 | shortcut].
    t = mm(m5a_wf, h) + m5a_bf[...]
    h = jnp.maximum(mm(m5a_w2, jnp.maximum(t[:Hq], 0.0)) + m5a_b2[...] + t[Hq:], 0.0)

    # output layer: (OUT, Hq) @ (Hq, tile_n) -> lane-dense store.
    out_ref[0] = mm(out_w, h) + out_b[...]


# ----------------------------------------------------------------------------- wrapper


def _cdiv(a, b):
    return -(-a // b)


def _prep_weights(p, H):
    """Transpose to channels-major (C_out, C_in) and fuse shared-LHS matmul pairs."""
    w = {}
    w["rb0_wf"] = jnp.concatenate([p["rb0_w1"], p["rb0_ws"]], axis=1).T   # (2H, 6)
    w["rb0_bf"] = jnp.concatenate([p["rb0_b1"], p["rb0_bs"]], axis=1).T   # (2H, 1)
    w["rb0_w2"] = p["rb0_w2"].T
    w["rb0_b2"] = p["rb0_b2"].T
    for name in ("rb1", "rb2"):
        w[f"{name}_w1"] = p[f"{name}_w1"].T
        w[f"{name}_b1"] = p[f"{name}_b1"].T
        w[f"{name}_w2"] = p[f"{name}_w2"].T
        w[f"{name}_b2"] = p[f"{name}_b2"].T
    # global MLP (concat([x_max, settings]) split along input dim)
    w["gm1_wx"] = p["gm1_w"][:H].T                                        # (2H, H)
    w["gm1_ws"] = p["gm1_w"][H:].T                                        # (2H, 6)
    w["gm1_b"] = p["gm1_b"].T
    w["gm2_w"] = p["gm2_w"].T                                             # (H, 2H)
    w["gm2_b"] = p["gm2_b"].T
    # mlp4 block 0: concat([x, x_global]) split; x-halves fused [fc1|shortcut]
    w["m4a_wx"] = jnp.concatenate([p["m4a_w1"][:H], p["m4a_ws"][:H]], axis=1).T  # (2H, H)
    w["m4a_wg"] = jnp.concatenate([p["m4a_w1"][H:], p["m4a_ws"][H:]], axis=1).T  # (2H, H)
    w["m4a_bg"] = jnp.concatenate([p["m4a_b1"], p["m4a_bs"]], axis=1).T          # (2H, 1)
    w["m4a_w2"] = p["m4a_w2"].T
    w["m4a_b2"] = p["m4a_b2"].T
    # mlp4 block 1 / mlp5 block 0: fused [fc1 | shortcut]
    for name in ("m4b", "m5a"):
        w[f"{name}_wf"] = jnp.concatenate([p[f"{name}_w1"], p[f"{name}_ws"]], axis=1).T
        w[f"{name}_bf"] = jnp.concatenate([p[f"{name}_b1"], p[f"{name}_bs"]], axis=1).T
        w[f"{name}_w2"] = p[f"{name}_w2"].T
        w[f"{name}_b2"] = p[f"{name}_b2"].T
    w["out_w"] = p["out_w"].T
    w["out_b"] = p["out_b"].T
    return w


def _pick_lane_tile(n, hidden, cin, cout, budget_bytes=6 << 20):
    """Lane tile (points on the 128-lane axis): multiple of 128, sized so the
    per-step double-buffered f32 footprint stays a few MiB (per grid step overhead
    ~0.35us, so bigger tiles amortize the grid loop across generations)."""
    per_col = 4 * (cin + 4 * hidden + cout) * 2
    t = (budget_bytes // per_col) // 128 * 128
    t = int(max(128, min(t, 4096)))
    n_lane = _cdiv(n, 128) * 128
    return min(t, n_lane)


def pointnet2_forward(initial_state, settings, params, *, hidden_dim, lane_tile=None):
    """initial_state: (B, N, 6) f32, settings: (B, 6) f32 -> (B, N, output_dim)."""
    B, N, Cin = initial_state.shape
    H = hidden_dim
    OUT = params["out_w"].shape[1]
    f32 = jnp.float32

    w = _prep_weights(params, H)

    if lane_tile is None:
        lane_tile = _pick_lane_tile(N, H, Cin, OUT)
    NT = _cdiv(N, lane_tile)
    lane_tile = _cdiv(_cdiv(N, NT), 128) * 128     # balance tiles, keep 128-multiple
    n_pad = NT * lane_tile

    # channels-major layout: (B, Cin, N_pad) so the point dim lives on lanes
    x_cm = jnp.transpose(initial_state, (0, 2, 1))
    if n_pad != N:
        x_cm = jnp.pad(x_cm, ((0, 0), (0, 0), (0, n_pad - N)))
    set_cm = settings[:, :, None]                  # (B, 6, 1)

    const2 = lambda b, nt: (0, 0)                  # weights: VMEM-resident across steps
    cparams = pltpu.CompilerParams(
        dimension_semantics=("parallel", "arbitrary"),
        vmem_limit_bytes=48 * 1024 * 1024)

    # ---- stage 1: encoder + per-batch max-pool + global head (last step) ------------
    stage1_w = [w["rb0_wf"], w["rb0_bf"], w["rb0_w2"], w["rb0_b2"],
                w["rb1_w1"], w["rb1_b1"], w["rb1_w2"], w["rb1_b2"],
                w["rb2_w1"], w["rb2_b1"], w["rb2_w2"], w["rb2_b2"],
                w["gm1_wx"], w["gm1_ws"], w["gm1_b"], w["gm2_w"], w["gm2_b"],
                w["m4a_wg"], w["m4a_bg"]]
    gcat = pl.pallas_call(
        functools.partial(_stage1_kernel, n_valid=N),
        grid=(B, NT),
        in_specs=[pl.BlockSpec((1, Cin, lane_tile), lambda b, nt: (b, 0, nt)),
                  pl.BlockSpec((1, Cin, 1), lambda b, nt: (b, 0, 0))]
        + [pl.BlockSpec(a.shape, const2) for a in stage1_w],
        out_specs=pl.BlockSpec((1, 2 * H, 1), lambda b, nt: (b, 0, 0)),
        out_shape=jax.ShapeDtypeStruct((B, 2 * H, 1), f32),
        scratch_shapes=[pltpu.VMEM((H, 1), f32)],
        compiler_params=cparams,
    )(x_cm, set_cm, *stage1_w)

    # ---- stage 2: recompute encoder + mlp4/mlp5 + output layer ----------------------
    stage2_w = [w["rb0_wf"], w["rb0_bf"], w["rb0_w2"], w["rb0_b2"],
                w["rb1_w1"], w["rb1_b1"], w["rb1_w2"], w["rb1_b2"],
                w["rb2_w1"], w["rb2_b1"], w["rb2_w2"], w["rb2_b2"],
                w["m4a_wx"], w["m4a_w2"], w["m4a_b2"],
                w["m4b_wf"], w["m4b_bf"], w["m4b_w2"], w["m4b_b2"],
                w["m5a_wf"], w["m5a_bf"], w["m5a_w2"], w["m5a_b2"],
                w["out_w"], w["out_b"]]
    out_cm = pl.pallas_call(
        _stage2_kernel,
        grid=(B, NT),
        in_specs=[pl.BlockSpec((1, Cin, lane_tile), lambda b, nt: (b, 0, nt)),
                  pl.BlockSpec((1, 2 * H, 1), lambda b, nt: (b, 0, 0))]
        + [pl.BlockSpec(a.shape, const2) for a in stage2_w],
        out_specs=pl.BlockSpec((1, OUT, lane_tile), lambda b, nt: (b, 0, nt)),
        out_shape=jax.ShapeDtypeStruct((B, OUT, n_pad), f32),
        compiler_params=pltpu.CompilerParams(
            dimension_semantics=("parallel", "parallel"),
            vmem_limit_bytes=48 * 1024 * 1024),
    )(x_cm, gcat, *stage2_w)

    return jnp.transpose(out_cm[:, :, :N], (0, 2, 1))             # (B, N, OUT)


# ----------------------------------------------------------------------------- reference


def _res_block_ref(x, w1, b1, w2, b2, ws=None, bs=None):
    identity = x if ws is None else x @ ws + bs
    out = jnp.maximum(x @ w1 + b1, 0.0)
    out = out @ w2 + b2
    return jnp.maximum(out + identity, 0.0)


def pointnet2_reference(initial_state, settings, p, *, hidden_dim):
    H = hidden_dim
    x = initial_state
    x = _res_block_ref(x, p["rb0_w1"], p["rb0_b1"], p["rb0_w2"], p["rb0_b2"],
                       p["rb0_ws"], p["rb0_bs"])
    x = _res_block_ref(x, p["rb1_w1"], p["rb1_b1"], p["rb1_w2"], p["rb1_b2"])
    x = _res_block_ref(x, p["rb2_w1"], p["rb2_b1"], p["rb2_w2"], p["rb2_b2"])
    x_global = jnp.max(x, axis=1)                                        # (B, H)
    x_global = jnp.concatenate([x_global, settings], axis=1)             # (B, H+6)
    x_global = jnp.maximum(x_global @ p["gm1_w"] + p["gm1_b"], 0.0)
    x_global = jnp.maximum(x_global @ p["gm2_w"] + p["gm2_b"], 0.0)      # (B, H)
    xg = jnp.broadcast_to(x_global[:, None, :], (x.shape[0], x.shape[1], H))
    x = jnp.concatenate([x, xg], axis=2)                                 # (B, N, 2H)
    x = _res_block_ref(x, p["m4a_w1"], p["m4a_b1"], p["m4a_w2"], p["m4a_b2"],
                       p["m4a_ws"], p["m4a_bs"])
    x = _res_block_ref(x, p["m4b_w1"], p["m4b_b1"], p["m4b_w2"], p["m4b_b2"],
                       p["m4b_ws"], p["m4b_bs"])
    x = _res_block_ref(x, p["m5a_w1"], p["m5a_b1"], p["m5a_w2"], p["m5a_b2"],
                       p["m5a_ws"], p["m5a_bs"])
    return x @ p["out_w"] + p["out_b"]


# ----------------------------------------------------------------------------- params


def make_params(key, *, hidden_dim, in_dim=6, output_dim=6):
    H = hidden_dim
    H2, Hh, Hq = 2 * H, H // 2, H // 4

    def lin(k, cin, cout, scale=0.1):
        kw, kb = jax.random.split(k)
        w = scale * jax.random.normal(kw, (cin, cout), dtype=jnp.float32)
        b = scale * jax.random.normal(kb, (1, cout), dtype=jnp.float32)
        return w, b

    keys = iter(jax.random.split(key, 19))
    p = {}
    p["rb0_w1"], p["rb0_b1"] = lin(next(keys), in_dim, H)
    p["rb0_w2"], p["rb0_b2"] = lin(next(keys), H, H)
    p["rb0_ws"], p["rb0_bs"] = lin(next(keys), in_dim, H)
    p["rb1_w1"], p["rb1_b1"] = lin(next(keys), H, H)
    p["rb1_w2"], p["rb1_b2"] = lin(next(keys), H, H)
    p["rb2_w1"], p["rb2_b1"] = lin(next(keys), H, H)
    p["rb2_w2"], p["rb2_b2"] = lin(next(keys), H, H)
    p["gm1_w"], p["gm1_b"] = lin(next(keys), H + in_dim, H2)
    p["gm2_w"], p["gm2_b"] = lin(next(keys), H2, H)
    p["m4a_w1"], p["m4a_b1"] = lin(next(keys), 2 * H, H)
    p["m4a_w2"], p["m4a_b2"] = lin(next(keys), H, H)
    p["m4a_ws"], p["m4a_bs"] = lin(next(keys), 2 * H, H)
    p["m4b_w1"], p["m4b_b1"] = lin(next(keys), H, Hh)
    p["m4b_w2"], p["m4b_b2"] = lin(next(keys), Hh, Hh)
    p["m4b_ws"], p["m4b_bs"] = lin(next(keys), H, Hh)
    p["m5a_w1"], p["m5a_b1"] = lin(next(keys), Hh, Hq)
    p["m5a_w2"], p["m5a_b2"] = lin(next(keys), Hq, Hq)
    p["m5a_ws"], p["m5a_bs"] = lin(next(keys), Hh, Hq)
    p["out_w"], p["out_b"] = lin(next(keys), Hq, output_dim)
    return p


# ----------------------------------------------------------------------------- main


if __name__ == "__main__":
    B, N = 2, 16
    HIDDEN = 32           # small, consistent with the module (divisible by 4)

    key = jax.random.PRNGKey(0)
    kx, ks, kp = jax.random.split(key, 3)
    initial_state = jax.random.normal(kx, (B, N, 6), dtype=jnp.float32)
    settings = jax.random.normal(ks, (B, 6), dtype=jnp.float32)
    params = make_params(kp, hidden_dim=HIDDEN)

    out = pointnet2_forward(initial_state, settings, params, hidden_dim=HIDDEN)
    out = jax.block_until_ready(out)

    ref = jax.block_until_ready(
        pointnet2_reference(initial_state, settings, params, hidden_dim=HIDDEN))
    assert out.shape == (B, N, 6)
    np.testing.assert_allclose(np.asarray(out), np.asarray(ref), rtol=1e-4, atol=1e-4)

    print("KERNEL_OK")
</pallas_src>

<mosaic_0001>
module attributes {stable_mosaic.version = 11 : i64} {
  func.func @_stage1_kernel(%arg0: i32, %arg1: i32, %arg2: memref<1x6x128xf32, #tpu.memory_space<vmem>>, %arg3: memref<1x6x1xf32, #tpu.memory_space<vmem>>, %arg4: memref<64x6xf32, #tpu.memory_space<vmem>>, %arg5: memref<64x1xf32, #tpu.memory_space<vmem>>, %arg6: memref<32x32xf32, #tpu.memory_space<vmem>>, %arg7: memref<32x1xf32, #tpu.memory_space<vmem>>, %arg8: memref<32x32xf32, #tpu.memory_space<vmem>>, %arg9: memref<32x1xf32, #tpu.memory_space<vmem>>, %arg10: memref<32x32xf32, #tpu.memory_space<vmem>>, %arg11: memref<32x1xf32, #tpu.memory_space<vmem>>, %arg12: memref<32x32xf32, #tpu.memory_space<vmem>>, %arg13: memref<32x1xf32, #tpu.memory_space<vmem>>, %arg14: memref<32x32xf32, #tpu.memory_space<vmem>>, %arg15: memref<32x1xf32, #tpu.memory_space<vmem>>, %arg16: memref<64x32xf32, #tpu.memory_space<vmem>>, %arg17: memref<64x6xf32, #tpu.memory_space<vmem>>, %arg18: memref<64x1xf32, #tpu.memory_space<vmem>>, %arg19: memref<32x64xf32, #tpu.memory_space<vmem>>, %arg20: memref<32x1xf32, #tpu.memory_space<vmem>>, %arg21: memref<64x32xf32, #tpu.memory_space<vmem>>, %arg22: memref<64x1xf32, #tpu.memory_space<vmem>>, %arg23: memref<1x64x1xf32, #tpu.memory_space<vmem>>, %arg24: memref<32x1xf32, #tpu.memory_space<vmem>>) attributes {dimension_semantics = [#tpu.dimension_semantics<parallel>, #tpu.dimension_semantics<arbitrary>], iteration_bounds = array<i64: 2, 1>, scalar_prefetch = 0 : i64, scratch_operands = 1 : i64, tpu.core_type = #tpu.core_type<tc>, window_params = [{transform_indices = @transform_0, window_bounds = array<i64: 1, 6, 128>}, {transform_indices = @transform_1, window_bounds = array<i64: 1, 6, 1>}, {pipeline_mode = #tpu.pipeline_mode<synchronous>, transform_indices = @transform_2, window_bounds = array<i64: 64, 6>}, {pipeline_mode = #tpu.pipeline_mode<synchronous>, transform_indices = @transform_3, window_bounds = array<i64: 64, 1>}, {pipeline_mode = #tpu.pipeline_mode<synchronous>, transform_indices = @transform_4, window_bounds = array<i64: 32, 32>}, {pipeline_mode = #tpu.pipeline_mode<synchronous>, transform_indices = @transform_5, window_bounds = array<i64: 32, 1>}, {pipeline_mode = #tpu.pipeline_mode<synchronous>, transform_indices = @transform_6, window_bounds = array<i64: 32, 32>}, {pipeline_mode = #tpu.pipeline_mode<synchronous>, transform_indices = @transform_7, window_bounds = array<i64: 32, 1>}, {pipeline_mode = #tpu.pipeline_mode<synchronous>, transform_indices = @transform_8, window_bounds = array<i64: 32, 32>}, {pipeline_mode = #tpu.pipeline_mode<synchronous>, transform_indices = @transform_9, window_bounds = array<i64: 32, 1>}, {pipeline_mode = #tpu.pipeline_mode<synchronous>, transform_indices = @transform_10, window_bounds = array<i64: 32, 32>}, {pipeline_mode = #tpu.pipeline_mode<synchronous>, transform_indices = @transform_11, window_bounds = array<i64: 32, 1>}, {pipeline_mode = #tpu.pipeline_mode<synchronous>, transform_indices = @transform_12, window_bounds = array<i64: 32, 32>}, {pipeline_mode = #tpu.pipeline_mode<synchronous>, transform_indices = @transform_13, window_bounds = array<i64: 32, 1>}, {pipeline_mode = #tpu.pipeline_mode<synchronous>, transform_indices = @transform_14, window_bounds = array<i64: 64, 32>}, {pipeline_mode = #tpu.pipeline_mode<synchronous>, transform_indices = @transform_15, window_bounds = array<i64: 64, 6>}, {pipeline_mode = #tpu.pipeline_mode<synchronous>, transform_indices = @transform_16, window_bounds = array<i64: 64, 1>}, {pipeline_mode = #tpu.pipeline_mode<synchronous>, transform_indices = @transform_17, window_bounds = array<i64: 32, 64>}, {pipeline_mode = #tpu.pipeline_mode<synchronous>, transform_indices = @transform_18, window_bounds = array<i64: 32, 1>}, {pipeline_mode = #tpu.pipeline_mode<synchronous>, transform_indices = @transform_19, window_bounds = array<i64: 64, 32>}, {pipeline_mode = #tpu.pipeline_mode<synchronous>, transform_indices = @transform_20, window_bounds = array<i64: 64, 1>}, {transform_indices = @transform_21, window_bounds = array<i64: 1, 64, 1>}]} {
    %c0 = arith.constant 0 : index
    %c0_0 = arith.constant 0 : index
    %c0_1 = arith.constant 0 : index
    %0 = vector.load %arg2[%c0, %c0_0, %c0_1] : memref<1x6x128xf32, #tpu.memory_space<vmem>>, vector<1x6x128xf32>
    %1 = vector.shape_cast %0 : vector<1x6x128xf32> to vector<6x128xf32>
    %c0_2 = arith.constant 0 : index
    %c0_3 = arith.constant 0 : index
    %2 = vector.load %arg4[%c0_2, %c0_3] : memref<64x6xf32, #tpu.memory_space<vmem>>, vector<64x6xf32>
    %cst = arith.constant dense<0.000000e+00> : vector<64x128xf32>
    %3 = tpu.matmul %2, %1, %cst {dimension_numbers = #tpu.dot_dimension_numbers<[1], [0], [0], [1], [0, 0, 1, 1], [], []>} : vector<64x6xf32>, vector<6x128xf32>, vector<64x128xf32> -> vector<64x128xf32>
    %c0_4 = arith.constant 0 : index
    %c0_5 = arith.constant 0 : index
    %4 = vector.load %arg5[%c0_4, %c0_5] : memref<64x1xf32, #tpu.memory_space<vmem>>, vector<64x1xf32>
    %5 = vector.broadcast %4 : vector<64x1xf32> to vector<64x128xf32>
    %6 = arith.addf %3, %5 : vector<64x128xf32>
    %7 = vector.extract_strided_slice %6 {offsets = [0, 0], sizes = [32, 128], strides = [1, 1]} : vector<64x128xf32> to vector<32x128xf32>
    %cst_6 = arith.constant 0.000000e+00 : f32
    %8 = vector.broadcast %cst_6 : f32 to vector<32x128xf32>
    %9 = arith.maximumf %7, %8 : vector<32x128xf32>
    %c0_7 = arith.constant 0 : index
    %c0_8 = arith.constant 0 : index
    %10 = vector.load %arg6[%c0_7, %c0_8] : memref<32x32xf32, #tpu.memory_space<vmem>>, vector<32x32xf32>
    %cst_9 = arith.constant dense<0.000000e+00> : vector<32x128xf32>
    %11 = tpu.matmul %10, %9, %cst_9 {dimension_numbers = #tpu.dot_dimension_numbers<[1], [0], [0], [1], [0, 0, 1, 1], [], []>} : vector<32x32xf32>, vector<32x128xf32>, vector<32x128xf32> -> vector<32x128xf32>
    %c0_10 = arith.constant 0 : index
    %c0_11 = arith.constant 0 : index
    %12 = vector.load %arg7[%c0_10, %c0_11] : memref<32x1xf32, #tpu.memory_space<vmem>>, vector<32x1xf32>
    %13 = vector.broadcast %12 : vector<32x1xf32> to vector<32x128xf32>
    %14 = arith.addf %11, %13 : vector<32x128xf32>
    %15 = vector.extract_strided_slice %6 {offsets = [32, 0], sizes = [32, 128], strides = [1, 1]} : vector<64x128xf32> to vector<32x128xf32>
    %16 = arith.addf %14, %15 : vector<32x128xf32>
    %cst_12 = arith.constant 0.000000e+00 : f32
    %17 = vector.broadcast %cst_12 : f32 to vector<32x128xf32>
    %18 = arith.maximumf %16, %17 : vector<32x128xf32>
    %c0_13 = arith.constant 0 : index
    %c0_14 = arith.constant 0 : index
    %19 = vector.load %arg8[%c0_13, %c0_14] : memref<32x32xf32, #tpu.memory_space<vmem>>, vector<32x32xf32>
    %cst_15 = arith.constant dense<0.000000e+00> : vector<32x128xf32>
    %20 = tpu.matmul %19, %18, %cst_15 {dimension_numbers = #tpu.dot_dimension_numbers<[1], [0], [0], [1], [0, 0, 1, 1], [], []>} : vector<32x32xf32>, vector<32x128xf32>, vector<32x128xf32> -> vector<32x128xf32>
    %c0_16 = arith.constant 0 : index
    %c0_17 = arith.constant 0 : index
    %21 = vector.load %arg9[%c0_16, %c0_17] : memref<32x1xf32, #tpu.memory_space<vmem>>, vector<32x1xf32>
    %22 = vector.broadcast %21 : vector<32x1xf32> to vector<32x128xf32>
    %23 = arith.addf %20, %22 : vector<32x128xf32>
    %cst_18 = arith.constant 0.000000e+00 : f32
    %24 = vector.broadcast %cst_18 : f32 to vector<32x128xf32>
    %25 = arith.maximumf %23, %24 : vector<32x128xf32>
    %c0_19 = arith.constant 0 : index
    %c0_20 = arith.constant 0 : index
    %26 = vector.load %arg10[%c0_19, %c0_20] : memref<32x32xf32, #tpu.memory_space<vmem>>, vector<32x32xf32>
    %cst_21 = arith.constant dense<0.000000e+00> : vector<32x128xf32>
    %27 = tpu.matmul %26, %25, %cst_21 {dimension_numbers = #tpu.dot_dimension_numbers<[1], [0], [0], [1], [0, 0, 1, 1], [], []>} : vector<32x32xf32>, vector<32x128xf32>, vector<32x128xf32> -> vector<32x128xf32>
    %c0_22 = arith.constant 0 : index
    %c0_23 = arith.constant 0 : index
    %28 = vector.load %arg11[%c0_22, %c0_23] : memref<32x1xf32, #tpu.memory_space<vmem>>, vector<32x1xf32>
    %29 = vector.broadcast %28 : vector<32x1xf32> to vector<32x128xf32>
    %30 = arith.addf %27, %29 : vector<32x128xf32>
    %31 = arith.addf %30, %18 : vector<32x128xf32>
    %cst_24 = arith.constant 0.000000e+00 : f32
    %32 = vector.broadcast %cst_24 : f32 to vector<32x128xf32>
    %33 = arith.maximumf %31, %32 : vector<32x128xf32>
    %c0_25 = arith.constant 0 : index
    %c0_26 = arith.constant 0 : index
    %34 = vector.load %arg12[%c0_25, %c0_26] : memref<32x32xf32, #tpu.memory_space<vmem>>, vector<32x32xf32>
    %cst_27 = arith.constant dense<0.000000e+00> : vector<32x128xf32>
    %35 = tpu.matmul %34, %33, %cst_27 {dimension_numbers = #tpu.dot_dimension_numbers<[1], [0], [0], [1], [0, 0, 1, 1], [], []>} : vector<32x32xf32>, vector<32x128xf32>, vector<32x128xf32> -> vector<32x128xf32>
    %c0_28 = arith.constant 0 : index
    %c0_29 = arith.constant 0 : index
    %36 = vector.load %arg13[%c0_28, %c0_29] : memref<32x1xf32, #tpu.memory_space<vmem>>, vector<32x1xf32>
    %37 = vector.broadcast %36 : vector<32x1xf32> to vector<32x128xf32>
    %38 = arith.addf %35, %37 : vector<32x128xf32>
    %cst_30 = arith.constant 0.000000e+00 : f32
    %39 = vector.broadcast %cst_30 : f32 to vector<32x128xf32>
    %40 = arith.maximumf %38, %39 : vector<32x128xf32>
    %c0_31 = arith.constant 0 : index
    %c0_32 = arith.constant 0 : index
    %41 = vector.load %arg14[%c0_31, %c0_32] : memref<32x32xf32, #tpu.memory_space<vmem>>, vector<32x32xf32>
    %cst_33 = arith.constant dense<0.000000e+00> : vector<32x128xf32>
    %42 = tpu.matmul %41, %40, %cst_33 {dimension_numbers = #tpu.dot_dimension_numbers<[1], [0], [0], [1], [0, 0, 1, 1], [], []>} : vector<32x32xf32>, vector<32x128xf32>, vector<32x128xf32> -> vector<32x128xf32>
    %c0_34 = arith.constant 0 : index
    %c0_35 = arith.constant 0 : index
    %43 = vector.load %arg15[%c0_34, %c0_35] : memref<32x1xf32, #tpu.memory_space<vmem>>, vector<32x1xf32>
    %44 = vector.broadcast %43 : vector<32x1xf32> to vector<32x128xf32>
    %45 = arith.addf %42, %44 : vector<32x128xf32>
    %46 = arith.addf %45, %33 : vector<32x128xf32>
    %cst_36 = arith.constant 0.000000e+00 : f32
    %47 = vector.broadcast %cst_36 : f32 to vector<32x128xf32>
    %48 = arith.maximumf %46, %47 : vector<32x128xf32>
    %c128_i32 = arith.constant 128 : i32
    %49 = arith.muli %arg1, %c128_i32 : i32
    %50 = tpu.iota {dimensions = array<i32: 1>} : vector<32x128xi32>
    %51 = vector.broadcast %49 : i32 to vector<32x128xi32>
    %52 = arith.addi %51, %50 : vector<32x128xi32>
    %c16_i32 = arith.constant 16 : i32
    %53 = vector.broadcast %c16_i32 : i32 to vector<32x128xi32>
    %54 = arith.cmpi slt, %52, %53 : vector<32x128xi32>
    %cst_37 = arith.constant 0xFF800000 : f32
    %55 = vector.broadcast %cst_37 : f32 to vector<32x128xf32>
    %56 = arith.select %54, %48, %55 : vector<32x128xi1>, vector<32x128xf32>
    %cst_38 = arith.constant dense<0xFF800000> : vector<32xf32>
    %57 = vector.multi_reduction <maximumf>, %56, %cst_38 [1] : vector<32x128xf32> to vector<32xf32>
    %58 = vector.shape_cast %57 : vector<32xf32> to vector<32x1xf32>
    %c0_i32 = arith.constant 0 : i32
    %59 = arith.cmpi eq, %arg1, %c0_i32 : i32
    %60 = arith.extui %59 : i1 to i32
    %c0_i32_39 = arith.constant 0 : i32
    %61 = arith.cmpi ne, %60, %c0_i32_39 : i32
    scf.if %61 {
      %c0_44 = arith.constant 0 : index
      %c0_45 = arith.constant 0 : index
      %68 = vector.load %arg24[%c0_44, %c0_45] : memref<32x1xf32, #tpu.memory_space<vmem>>, vector<32x1xf32>
      tpu.vector_store %arg24[%c0_44, %c0_45], %58 {strides = array<i32>} : memref<32x1xf32, #tpu.memory_space<vmem>>, vector<32x1xf32>,
    } else {
    }
    %c0_i32_40 = arith.constant 0 : i32
    %62 = arith.cmpi sgt, %arg1, %c0_i32_40 : i32
    %63 = arith.extui %62 : i1 to i32
    %c0_i32_41 = arith.constant 0 : i32
    %64 = arith.cmpi ne, %63, %c0_i32_41 : i32
    scf.if %64 {
      %c0_44 = arith.constant 0 : index
      %c0_45 = arith.constant 0 : index
      %68 = vector.load %arg24[%c0_44, %c0_45] : memref<32x1xf32, #tpu.memory_space<vmem>>, vector<32x1xf32>
      %69 = arith.maximumf %68, %58 : vector<32x1xf32>
      %c0_46 = arith.constant 0 : index
      %c0_47 = arith.constant 0 : index
      %70 = vector.load %arg24[%c0_46, %c0_47] : memref<32x1xf32, #tpu.memory_space<vmem>>, vector<32x1xf32>
      tpu.vector_store %arg24[%c0_46, %c0_47], %69 {strides = array<i32>} : memref<32x1xf32, #tpu.memory_space<vmem>>, vector<32x1xf32>,
    } else {
    }
    %c0_i32_42 = arith.constant 0 : i32
    %65 = arith.cmpi eq, %arg1, %c0_i32_42 : i32
    %66 = arith.extui %65 : i1 to i32
    %c0_i32_43 = arith.constant 0 : i32
    %67 = arith.cmpi ne, %66, %c0_i32_43 : i32
    scf.if %67 {
      %c0_44 = arith.constant 0 : index
      %c0_45 = arith.constant 0 : index
      %68 = vector.load %arg24[%c0_44, %c0_45] : memref<32x1xf32, #tpu.memory_space<vmem>>, vector<32x1xf32>
      %c0_46 = arith.constant 0 : index
      %c0_47 = arith.constant 0 : index
      %69 = vector.load %arg16[%c0_46, %c0_47] : memref<64x32xf32, #tpu.memory_space<vmem>>, vector<64x32xf32>
      %cst_48 = arith.constant dense<0.000000e+00> : vector<64x1xf32>
      %70 = tpu.matmul %69, %68, %cst_48 {dimension_numbers = #tpu.dot_dimension_numbers<[1], [0], [0], [1], [0, 0, 1, 1], [], []>} : vector<64x32xf32>, vector<32x1xf32>, vector<64x1xf32> -> vector<64x1xf32>
      %c0_49 = arith.constant 0 : index
      %c0_50 = arith.constant 0 : index
      %c0_51 = arith.constant 0 : index
      %71 = vector.load %arg3[%c0_49, %c0_50, %c0_51] : memref<1x6x1xf32, #tpu.memory_space<vmem>>, vector<1x6x1xf32>
      %72 = vector.shape_cast %71 : vector<1x6x1xf32> to vector<6x1xf32>
      %c0_52 = arith.constant 0 : index
      %c0_53 = arith.constant 0 : index
      %73 = vector.load %arg17[%c0_52, %c0_53] : memref<64x6xf32, #tpu.memory_space<vmem>>, vector<64x6xf32>
      %cst_54 = arith.constant dense<0.000000e+00> : vector<64x1xf32>
      %74 = tpu.matmul %73, %72, %cst_54 {dimension_numbers = #tpu.dot_dimension_numbers<[1], [0], [0], [1], [0, 0, 1, 1], [], []>} : vector<64x6xf32>, vector<6x1xf32>, vector<64x1xf32> -> vector<64x1xf32>
      %75 = arith.addf %70, %74 : vector<64x1xf32>
      %c0_55 = arith.constant 0 : index
      %c0_56 = arith.constant 0 : index
      %76 = vector.load %arg18[%c0_55, %c0_56] : memref<64x1xf32, #tpu.memory_space<vmem>>, vector<64x1xf32>
      %77 = arith.addf %75, %76 : vector<64x1xf32>
      %cst_57 = arith.constant 0.000000e+00 : f32
      %78 = vector.broadcast %cst_57 : f32 to vector<64x1xf32>
      %79 = arith.maximumf %77, %78 : vector<64x1xf32>
      %c0_58 = arith.constant 0 : index
      %c0_59 = arith.constant 0 : index
      %80 = vector.load %arg19[%c0_58, %c0_59] : memref<32x64xf32, #tpu.memory_space<vmem>>, vector<32x64xf32>
      %cst_60 = arith.constant dense<0.000000e+00> : vector<32x1xf32>
      %81 = tpu.matmul %80, %79, %cst_60 {dimension_numbers = #tpu.dot_dimension_numbers<[1], [0], [0], [1], [0, 0, 1, 1], [], []>} : vector<32x64xf32>, vector<64x1xf32>, vector<32x1xf32> -> vector<32x1xf32>
      %c0_61 = arith.constant 0 : index
      %c0_62 = arith.constant 0 : index
      %82 = vector.load %arg20[%c0_61, %c0_62] : memref<32x1xf32, #tpu.memory_space<vmem>>, vector<32x1xf32>
      %83 = arith.addf %81, %82 : vector<32x1xf32>
      %cst_63 = arith.constant 0.000000e+00 : f32
      %84 = vector.broadcast %cst_63 : f32 to vector<32x1xf32>
      %85 = arith.maximumf %83, %84 : vector<32x1xf32>
      %c0_64 = arith.constant 0 : index
      %c0_65 = arith.constant 0 : index
      %86 = vector.load %arg21[%c0_64, %c0_65] : memref<64x32xf32, #tpu.memory_space<vmem>>, vector<64x32xf32>
      %cst_66 = arith.constant dense<0.000000e+00> : vector<64x1xf32>
      %87 = tpu.matmul %86, %85, %cst_66 {dimension_numbers = #tpu.dot_dimension_numbers<[1], [0], [0], [1], [0, 0, 1, 1], [], []>} : vector<64x32xf32>, vector<32x1xf32>, vector<64x1xf32> -> vector<64x1xf32>
      %c0_67 = arith.constant 0 : index
      %c0_68 = arith.constant 0 : index
      %88 = vector.load %arg22[%c0_67, %c0_68] : memref<64x1xf32, #tpu.memory_space<vmem>>, vector<64x1xf32>
      %89 = arith.addf %87, %88 : vector<64x1xf32>
      %c0_69 = arith.constant 0 : index
      %c0_70 = arith.constant 0 : index
      %c0_71 = arith.constant 0 : index
      %90 = vector.load %arg23[%c0_69, %c0_70, %c0_71] : memref<1x64x1xf32, #tpu.memory_space<vmem>>, vector<1x64x1xf32>
      %91 = vector.shape_cast %90 : vector<1x64x1xf32> to vector<64x1xf32>
      %92 = vector.shape_cast %89 : vector<64x1xf32> to vector<1x64x1xf32>
      tpu.vector_store %arg23[%c0_69, %c0_70, %c0_71], %92 {strides = array<i32>} : memref<1x64x1xf32, #tpu.memory_space<vmem>>, vector<1x64x1xf32>,
    } else {
    }
    return
  }
  func.func @transform_0(%arg0: i32, %arg1: i32) -> (i32, i32, i32) {
    %c0_i32 = arith.constant 0 : i32
    %c0_i32_0 = arith.constant 0 : i32
    return %arg0, %c0_i32, %arg1 : i32, i32, i32
  }
  func.func @transform_1(%arg0: i32, %arg1: i32) -> (i32, i32, i32) {
    %c0_i32 = arith.constant 0 : i32
    %c0_i32_0 = arith.constant 0 : i32
    %c0_i32_1 = arith.constant 0 : i32
    return %arg0, %c0_i32, %c0_i32_0 : i32, i32, i32
  }
  func.func @transform_2(%arg0: i32, %arg1: i32) -> (i32, i32) {
    %c0_i32 = arith.constant 0 : i32
    %c0_i32_0 = arith.constant 0 : i32
    %c0_i32_1 = arith.constant 0 : i32
    return %c0_i32, %c0_i32_0 : i32, i32
  }
  func.func @transform_3(%arg0: i32, %arg1: i32) -> (i32, i32) {
    %c0_i32 = arith.constant 0 : i32
    %c0_i32_0 = arith.constant 0 : i32
    %c0_i32_1 = arith.constant 0 : i32
    return %c0_i32, %c0_i32_0 : i32, i32
  }
  func.func @transform_4(%arg0: i32, %arg1: i32) -> (i32, i32) {
    %c0_i32 = arith.constant 0 : i32
    %c0_i32_0 = arith.constant 0 : i32
    %c0_i32_1 = arith.constant 0 : i32
    return %c0_i32, %c0_i32_0 : i32, i32
  }
  func.func @transform_5(%arg0: i32, %arg1: i32) -> (i32, i32) {
    %c0_i32 = arith.constant 0 : i32
    %c0_i32_0 = arith.constant 0 : i32
    %c0_i32_1 = arith.constant 0 : i32
    return %c0_i32, %c0_i32_0 : i32, i32
  }
  func.func @transform_6(%arg0: i32, %arg1: i32) -> (i32, i32) {
    %c0_i32 = arith.constant 0 : i32
    %c0_i32_0 = arith.constant 0 : i32
    %c0_i32_1 = arith.constant 0 : i32
    return %c0_i32, %c0_i32_0 : i32, i32
  }
  func.func @transform_7(%arg0: i32, %arg1: i32) -> (i32, i32) {
    %c0_i32 = arith.constant 0 : i32
    %c0_i32_0 = arith.constant 0 : i32
    %c0_i32_1 = arith.constant 0 : i32
    return %c0_i32, %c0_i32_0 : i32, i32
  }
  func.func @transform_8(%arg0: i32, %arg1: i32) -> (i32, i32) {
    %c0_i32 = arith.constant 0 : i32
    %c0_i32_0 = arith.constant 0 : i32
    %c0_i32_1 = arith.constant 0 : i32
    return %c0_i32, %c0_i32_0 : i32, i32
  }
  func.func @transform_9(%arg0: i32, %arg1: i32) -> (i32, i32) {
    %c0_i32 = arith.constant 0 : i32
    %c0_i32_0 = arith.constant 0 : i32
    %c0_i32_1 = arith.constant 0 : i32
    return %c0_i32, %c0_i32_0 : i32, i32
  }
  func.func @transform_10(%arg0: i32, %arg1: i32) -> (i32, i32) {
    %c0_i32 = arith.constant 0 : i32
    %c0_i32_0 = arith.constant 0 : i32
    %c0_i32_1 = arith.constant 0 : i32
    return %c0_i32, %c0_i32_0 : i32, i32
  }
  func.func @transform_11(%arg0: i32, %arg1: i32) -> (i32, i32) {
    %c0_i32 = arith.constant 0 : i32
    %c0_i32_0 = arith.constant 0 : i32
    %c0_i32_1 = arith.constant 0 : i32
    return %c0_i32, %c0_i32_0 : i32, i32
  }
  func.func @transform_12(%arg0: i32, %arg1: i32) -> (i32, i32) {
    %c0_i32 = arith.constant 0 : i32
    %c0_i32_0 = arith.constant 0 : i32
    %c0_i32_1 = arith.constant 0 : i32
    return %c0_i32, %c0_i32_0 : i32, i32
  }
  func.func @transform_13(%arg0: i32, %arg1: i32) -> (i32, i32) {
    %c0_i32 = arith.constant 0 : i32
    %c0_i32_0 = arith.constant 0 : i32
    %c0_i32_1 = arith.constant 0 : i32
    return %c0_i32, %c0_i32_0 : i32, i32
  }
  func.func @transform_14(%arg0: i32, %arg1: i32) -> (i32, i32) {
    %c0_i32 = arith.constant 0 : i32
    %c0_i32_0 = arith.constant 0 : i32
    %c0_i32_1 = arith.constant 0 : i32
    return %c0_i32, %c0_i32_0 : i32, i32
  }
  func.func @transform_15(%arg0: i32, %arg1: i32) -> (i32, i32) {
    %c0_i32 = arith.constant 0 : i32
    %c0_i32_0 = arith.constant 0 : i32
    %c0_i32_1 = arith.constant 0 : i32
    return %c0_i32, %c0_i32_0 : i32, i32
  }
  func.func @transform_16(%arg0: i32, %arg1: i32) -> (i32, i32) {
    %c0_i32 = arith.constant 0 : i32
    %c0_i32_0 = arith.constant 0 : i32
    %c0_i32_1 = arith.constant 0 : i32
    return %c0_i32, %c0_i32_0 : i32, i32
  }
  func.func @transform_17(%arg0: i32, %arg1: i32) -> (i32, i32) {
    %c0_i32 = arith.constant 0 : i32
    %c0_i32_0 = arith.constant 0 : i32
    %c0_i32_1 = arith.constant 0 : i32
    return %c0_i32, %c0_i32_0 : i32, i32
  }
  func.func @transform_18(%arg0: i32, %arg1: i32) -> (i32, i32) {
    %c0_i32 = arith.constant 0 : i32
    %c0_i32_0 = arith.constant 0 : i32
    %c0_i32_1 = arith.constant 0 : i32
    return %c0_i32, %c0_i32_0 : i32, i32
  }
  func.func @transform_19(%arg0: i32, %arg1: i32) -> (i32, i32) {
    %c0_i32 = arith.constant 0 : i32
    %c0_i32_0 = arith.constant 0 : i32
    %c0_i32_1 = arith.constant 0 : i32
    return %c0_i32, %c0_i32_0 : i32, i32
  }
  func.func @transform_20(%arg0: i32, %arg1: i32) -> (i32, i32) {
    %c0_i32 = arith.constant 0 : i32
    %c0_i32_0 = arith.constant 0 : i32
    %c0_i32_1 = arith.constant 0 : i32
    return %c0_i32, %c0_i32_0 : i32, i32
  }
  func.func @transform_21(%arg0: i32, %arg1: i32) -> (i32, i32, i32) {
    %c0_i32 = arith.constant 0 : i32
    %c0_i32_0 = arith.constant 0 : i32
    %c0_i32_1 = arith.constant 0 : i32
    return %arg0, %c0_i32, %c0_i32_0 : i32, i32, i32
  }
}

</mosaic_0001>

<bundles_post_ra>
// kernel: tpu_custom_call.1
= control target key start
LH: loop header
LB: loop body
LE: loop exit
PB: predicated region body
PF: predicated region fallthrough
CT: control target
= control target key end

     0   :  { %s2732_s25 = smov 0   ;;  %s2734_s26 = smov 0   ;;  %s3190_s0 = inlined_call_operand.vmem [shape: f32[2,6,128], index: 0, kind: input, shape index: {}]   ;;  %s3191_s1 = inlined_call_operand.vmem [shape: f32[2,6,1], index: 1, kind: input, shape index: {}]   ;;  %s3192_s2 = inlined_call_operand.vmem [shape: f32[64,6], index: 2, kind: input, shape index: {}]   ;;  %s3193_s3 = inlined_call_operand.vmem [shape: f32[64,1], index: 3, kind: input, shape index: {}]   ;;  %s3194_s4 = inlined_call_operand.vmem [shape: f32[32,32], index: 4, kind: input, shape index: {}]   ;;  %s3195_s5 = inlined_call_operand.vmem [shape: f32[32,1], index: 5, kind: input, shape index: {}]   ;;  %s3196_s6 = inlined_call_operand.vmem [shape: f32[32,32], index: 6, kind: input, shape index: {}]   ;;  %s3197_s7 = inlined_call_operand.vmem [shape: f32[32,1], index: 7, kind: input, shape index: {}]   ;;  %s3198_s8 = inlined_call_operand.vmem [shape: f32[32,32], index: 8, kind: input, shape index: {}]   ;;  %s3199_s9 = inlined_call_operand.vmem [shape: f32[32,1], index: 9, kind: input, shape index: {}]   ;;  %s3200_s10 = inlined_call_operand.vmem [shape: f32[32,32], index: 10, kind: input, shape index: {}]   ;;  %s3201_s11 = inlined_call_operand.vmem [shape: f32[32,1], index: 11, kind: input, shape index: {}]   ;;  %s3202_s12 = inlined_call_operand.vmem [shape: f32[32,32], index: 12, kind: input, shape index: {}]   ;;  %s3203_s13 = inlined_call_operand.vmem [shape: f32[32,1], index: 13, kind: input, shape index: {}]   ;;  %s3204_s14 = inlined_call_operand.vmem [shape: f32[64,32], index: 14, kind: input, shape index: {}]   ;;  %s3205_s15 = inlined_call_operand.vmem [shape: f32[64,6], index: 15, kind: input, shape index: {}]   ;;  %s3206_s16 = inlined_call_operand.vmem [shape: f32[64,1], index: 16, kind: input, shape index: {}]   ;;  %s3207_s17 = inlined_call_operand.vmem [shape: f32[32,64], index: 17, kind: input, shape index: {}]   ;;  %s3208_s18 = inlined_call_operand.vmem [shape: f32[32,1], index: 18, kind: input, shape index: {}]   ;;  %s3209_s19 = inlined_call_operand.vmem [shape: f32[64,32], index: 19, kind: input, shape index: {}]   ;;  %s3210_s20 = inlined_call_operand.vmem [shape: f32[64,1], index: 20, kind: input, shape index: {}]   ;;  %s3211_s21 = inlined_call_operand.vmem [shape: f32[2,64,1], index: 21, kind: output, shape index: {}]  }
   0x1   :  { %3218 = sst [smem:[#allocation6_spill]] %s3190_s0 }
   0x2   :  { %3219 = sst [smem:[#allocation7_spill]] %s3191_s1 }
   0x3   :  { %3220 = sst [smem:[#allocation8_spill]] %s3192_s2  ;;  %s2730_s2 = smov 0  }
   0x4   :  { %3221 = sst [smem:[#allocation9_spill]] %s3193_s3 }
   0x5   :  { %3222 = sst [smem:[#allocation10_spill]] %s3194_s4 }
   0x6   :  { %3223 = sst [smem:[#allocation11_spill]] %s3195_s5 }
   0x7 LB: > { %3224 = sst [smem:[#allocation3_spill]] %s2613_s25  ;;  %s43_s27 = sadd.s32 1, %s2613_s25  ;;  %s2617_s26 = sphi %s2734_s26, %s31_s26   ;;  %s2613_s25 = sphi %s2732_s25, %s3235_s25   ;;  %s2609_s2 = sphi %s2730_s2, %s3234_s2  }
   0x8   : > { %3225 = sst [smem:[#allocation4_spill]] %s2617_s26  ;;  %p2246_p0 = scmp.ge.s32.totalorder %s2617_s26, 1 }
   0x9   : > { %p45_p1 = scmp.ge.s32.totalorder %s43_s27, 2  ;;  %p612_p2 = scmp.lt.s32.totalorder %s2617_s26, 3 }
   0xb   : > { %s3237_s27 = smov (%p45_p1, %s43_s27), 0  ;;  %p613_p3 = pnand %p2246_p0, %p612_p2 }
   0xc   : > { %3226 = sst [smem:[#allocation5_spill]] %s3237_s27  ;;  %p678_p4 = scmp.lt.s32.totalorder (!%p613_p3), %s2609_s2, 1 }
   0xd   : > { %616 = sbr.rel (%p613_p3) target bundleno = 2080 (0x820), region = 104  ;;  %s3227_s29 = sld [smem:[#allocation8_spill]] (!%p613_p3) }
   0xe   : > { %s3228_s22 = sld [smem:[#allocation9_spill]] (!%p613_p3) }
   0xf   : > { %s3229_s0 = sld [smem:[#allocation6_spill]] (!%p613_p3) }
  0x10   : > { %s3230_s27 = sld [smem:[#allocation11_spill]] (!%p613_p3) }
  0x11   : > { %s3231_s23 = sld [smem:[#allocation10_spill]] (!%p613_p3) }
  0x12   : > { %vm751_vm0 = vcmask 48128   ;;  %s3239_s2 = smov (!%p678_p4, %s2609_s2), 1  ;;  %v2619_v2 = vmov 0   ;;  %vm776_vm1 = vcmask 1045504   ;;  %v1030_v22 = vld [vmem:[%s3197_s7 + $0x18] sm:$0xff]  ;;  %v1029_v23 = vld [vmem:[%s3197_s7 + $0x10] sm:$0xff] }
  0x13   : > { %v695_v0 = vld [vmem:[%s3227_s29] sm:$0xff]  ;;  %2593 = vset.pattern.permute.xlu0 %v2619_v2  ;;  %2594 = vset.pattern.permute.xlu1 %v2619_v2  ;;  %s2247_s24 = sshll.u32 %s3239_s2, 3  ;;  %v696_v6 = vld [vmem:[%s3227_s29 + $0x8] sm:$0xff]  ;;  %v697_v8 = vld [vmem:[%s3227_s29 + $0x10] sm:$0xff]  ;;  %vm917_vm2 = vcmask 261120   ;;  %vm1569_vm4 = vcmask 7168  }
  0x14   : > { %v699_v1 = vld [vmem:[%s3227_s29 + $0x20] sm:$0xff]  ;;  %2408 = vmatprep.mubr.msk.f32.mxu0 %vm751_vm0, %v695_v0  ;;  %v706_v3 = vld [vmem:[%s3228_s22 + $0x18] sm:$0xff]  ;;  %v704_v4 = vld [vmem:[%s3228_s22 + $0x8] sm:$0xff]  ;;  %vm1908_vm5 = vcmask 523264  }
  0x15   : > { %2414 = vmatprep.mubr.msk.f32.mxu1 %vm751_vm0, %v699_v1  ;;  %728 = vperm.xlu0 %2593, %v706_v3   ;;  %s684_s4 = scalar_lea.vmem %s3229_s0, %s2247_s24  ;;  %v700_v7 = vld [vmem:[%s3227_s29 + $0x28] sm:$0xff]  ;;  %v701_v9 = vld [vmem:[%s3227_s29 + $0x30] sm:$0xff]  ;;  %v703_v11 = vld [vmem:[%s3228_s22] sm:$0xff]  ;;  %s3232_s0 = sld [smem:[#allocation7_spill]] }
  0x16   : > { %718 = vperm.xlu1 %2594, %v704_v4   ;;  %v694_v5 = vld [vmem:[%s684_s4] sm:$0x3f]  ;;  %v705_v10 = vld [vmem:[%s3228_s22 + $0x10] sm:$0xff]  ;;  %v698_v12 = vld [vmem:[%s3227_s29 + $0x18] sm:$0xff]  ;;  %s2311_s4 = sshll.u32 %s3239_s2, 6 }
  0x17   : > { %2406 = vmatprep.subr.msk.mxu0 %vm776_vm1, %v694_v5  ;;  %2566 = vmatprep.subr.msk.mxu1 %vm776_vm1, %v694_v5  ;;  %v702_v13 = vld [vmem:[%s3227_s29 + $0x38] sm:$0xff]  ;;  %v709_v16 = vld [vmem:[%s3228_s22 + $0x30] sm:$0xff]  ;;  %v708_v18 = vld [vmem:[%s3228_s22 + $0x28] sm:$0xff]  ;;  %s3142_s25 = scalar_lea.vmem %s3211_s21, %s2311_s4 }
  0x18   : > { %2407 = vmatpush3.msk.msra.mxu0 %vm776_vm1, %v694_v5  ;;  %2567 = vmatpush3.msk.msra.mxu1 %vm776_vm1, %v694_v5  ;;  %v710_v14 = vld [vmem:[%s3228_s22 + $0x38] sm:$0xff]  ;;  %v895_v17 = vld [vmem:[%s3230_s27 + $0x10] sm:$0xff]  ;;  %v894_v19 = vld [vmem:[%s3230_s27 + $0x8] sm:$0xff] }
  0x19   : > { %2409 = vmatmul.mubr.msk.f32.vlgmr.msra.gmra.mxu0 %vm751_vm0, %v696_v6  ;;  %2415 = vmatmul.mubr.msk.f32.vlgmr.msra.gmra.mxu1 %vm751_vm0, %v700_v7  ;;  %v896_v15 = vld [vmem:[%s3230_s27 + $0x18] sm:$0xff]  ;;  %v707_v20 = vld [vmem:[%s3228_s22 + $0x20] sm:$0xff]  ;;  %v1028_v24 = vld [vmem:[%s3197_s7 + $0x8] sm:$0xff] }
  0x1a   : > { %2411 = vmatprep.mubr.msk.f32.mxu0 %vm751_vm0, %v697_v8  ;;  %2417 = vmatprep.mubr.msk.f32.mxu1 %vm751_vm0, %v701_v9  ;;  %v893_v21 = vld [vmem:[%s3230_s27] sm:$0xff]  ;;  %v1159_v26 = vld [vmem:[%s3199_s9 + $0x18] sm:$0xff]  ;;  %v1158_v27 = vld [vmem:[%s3199_s9 + $0x10] sm:$0xff] }
  0x1b   : > { %723 = vperm.xlu0 %2593, %v705_v10   ;;  %713 = vperm.xlu1 %2594, %v703_v11   ;;  %v1027_v25 = vld [vmem:[%s3197_s7] sm:$0xff]  ;;  %v1157_v28 = vld [vmem:[%s3199_s9 + $0x8] sm:$0xff]  ;;  %v1292_v30 = vld [vmem:[%s3201_s11 + $0x18] sm:$0xff]  ;;  %s688_s26 = scalar_lea.vmem %s3232_s0, %s2247_s24 }
  0x1c   : > { %v1156_v29 = vld [vmem:[%s3199_s9] sm:$0xff]  ;;  %v1291_v31 = vld [vmem:[%s3201_s11 + $0x10] sm:$0xff]  ;;  %v1290_v32 = vld [vmem:[%s3201_s11 + $0x8] sm:$0xff] }
  0x1d   : > { %2412 = vmatmul.mubr.msk.f32.gmra.mxu0 %vm751_vm0, %v698_v12  ;;  %2418 = vmatmul.mubr.msk.f32.gmra.mxu1 %vm751_vm0, %v702_v13  ;;  %v1289_v33 = vld [vmem:[%s3201_s11] sm:$0xff]  ;;  %v1421_v34 = vld [vmem:[%s3203_s13 + $0x18] sm:$0xff]  ;;  %v1420_v35 = vld [vmem:[%s3203_s13 + $0x10] sm:$0xff] }
  0x1e   : > { %v1419_v36 = vld [vmem:[%s3203_s13 + $0x8] sm:$0xff]  ;;  %v1418_v37 = vld [vmem:[%s3203_s13] sm:$0xff]  ;;  %v891_v56 = vld [vmem:[%s3231_s23 + $0x10] sm:$0xff] }
  0x1f   : > { %748 = vperm.xlu0 %2593, %v710_v14   ;;  %914 = vperm.xlu1 %2594, %v896_v15   ;;  %v889_v38 = vld [vmem:[%s3231_s23] sm:$0xff]  ;;  %v890_v55 = vld [vmem:[%s3231_s23 + $0x8] sm:$0xff]  ;;  %v892_v57 = vld [vmem:[%s3231_s23 + $0x18] sm:$0xff] }
  0x20   : > { %2428 = vmatprep.mubr.msk.f32.mxu1 %vm917_vm2, %v889_v38  ;;  %v1023_v58 = vld [vmem:[%s3196_s6] sm:$0xff] }
  0x23   : > { %743 = vperm.xlu0 %2593, %v709_v16   ;;  %909 = vperm.xlu1 %2594, %v895_v17  }
  0x27   : > { %738 = vperm.xlu0 %2593, %v708_v18   ;;  %904 = vperm.xlu1 %2594, %v894_v19  }
  0x2b   : > { %733 = vperm.xlu0 %2593, %v707_v20   ;;  %899 = vperm.xlu1 %2594, %v893_v21  }
  0x2f   : > { %1048 = vperm.xlu0 %2593, %v1030_v22   ;;  %1043 = vperm.xlu1 %2594, %v1029_v23  }
  0x33   : > { %1038 = vperm.xlu0 %2593, %v1028_v24   ;;  %1033 = vperm.xlu1 %2594, %v1027_v25  }
  0x37   : > { %1177 = vperm.xlu0 %2593, %v1159_v26   ;;  %1172 = vperm.xlu1 %2594, %v1158_v27   ;;  %v1024_v27 = vld [vmem:[%s3196_s6 + $0x8] sm:$0xff] }
  0x3b   : > { %1167 = vperm.xlu0 %2593, %v1157_v28   ;;  %1162 = vperm.xlu1 %2594, %v1156_v29   ;;  %v1025_v28 = vld [vmem:[%s3196_s6 + $0x10] sm:$0xff]  ;;  %v1026_v29 = vld [vmem:[%s3196_s6 + $0x18] sm:$0xff] }
  0x3f   : > { %1310 = vperm.xlu0 %2593, %v1292_v30   ;;  %1305 = vperm.xlu1 %2594, %v1291_v31   ;;  %v1152_v30 = vld [vmem:[%s3198_s8] sm:$0xff] }
  0x40   : > { %2456 = vmatprep.mubr.msk.f32.mxu0 %vm917_vm2, %v1152_v30 }
  0x43   : > { %1300 = vperm.xlu0 %2593, %v1290_v32   ;;  %1295 = vperm.xlu1 %2594, %v1289_v33  }
  0x47   : > { %1439 = vperm.xlu0 %2593, %v1421_v34   ;;  %1434 = vperm.xlu1 %2594, %v1420_v35  }
  0x4b   : > { %1429 = vperm.xlu0 %2593, %v1419_v36   ;;  %1424 = vperm.xlu1 %2594, %v1418_v37  }
  0x90   : > { %v729_v39 = vpop.permute.xlu0 %728 }
  0x91   : > { %v719_v41 = vpop.permute.xlu1 %718 }
  0x96   : > { %v724_v45 = vpop.permute.xlu0 %723  ;;  %v714_v50 = vpop.permute.xlu1 %713 }
  0x9a   : > { %v915_v60 = vpop.permute.xlu1 %914  ;;  %v749_v61 = vpop.permute.xlu0 %748 }
  0x9e   : > { %v910_v63 = vpop.permute.xlu1 %909  ;;  %v744_v1 = vpop.permute.xlu0 %743 }
  0xa2   : > { %v905_v3 = vpop.permute.xlu1 %904  ;;  %v739_v5 = vpop.permute.xlu0 %738 }
  0xa6   : > { %v900_v11 = vpop.permute.xlu1 %899  ;;  %v734_v18 = vpop.permute.xlu0 %733 }
  0xaa   : > { %v1049_v31 = vpop.permute.xlu0 %1048  ;;  %v1044_v33 = vpop.permute.xlu1 %1043 }
  0xae   : > { %v1039_v37 = vpop.permute.xlu0 %1038 }
  0xd9   : > { %v2410_v40 = vpop.f32.mrf.mxu0  ;;  %v2416_v59 = vpop.f32.mrf.mxu1 }
  0xda   : > { %v852_v47 = vadd.f32 %v2410_v40, %v719_v41  ;;  %v872_v12 = vadd.f32 %v2416_v59, %v739_v5 }
  0xdb   : > { %v846_v42 = vpop.f32.mrf.mxu0  ;;  %v866_v62 = vpop.f32.mrf.mxu1 }
  0xdc   : > { %v847_v51 = vadd.f32 %v846_v42, %v714_v50  ;;  %v886_v53 = vmax.f32 %v852_v47, 0.0  ;;  %v867_v19 = vadd.f32 %v866_v62, %v734_v18  ;;  %v1034_v42 = vpop.permute.xlu1 %1033  ;;  %v1153_v47 = vld [vmem:[%s3198_s8 + $0x8] sm:$0xff]  ;;  %v1285_v50 = vld [vmem:[%s3200_s10] sm:$0xff] }
  0xdd   : > { %v2413_v43 = vpop.f32.mrf.mxu0  ;;  %v2419_v0 = vpop.f32.mrf.mxu1 }
  0xde   : > { %v862_v44 = vadd.f32 %v2413_v43, %v729_v39  ;;  %v885_v54 = vmax.f32 %v847_v51, 0.0  ;;  %v882_v8 = vadd.f32 %v2419_v0, %v749_v61  ;;  %v1178_v51 = vpop.permute.xlu0 %1177 }
  0xdf   : > { %v856_v46 = vpop.f32.mrf.mxu0  ;;  %v876_v2 = vpop.f32.mrf.mxu1 }
  0xe0   : > { %v888_v48 = vmax.f32 %v862_v44, 0.0  ;;  %v857_v49 = vadd.f32 %v856_v46, %v724_v45  ;;  %v877_v14 = vadd.f32 %v876_v2, %v744_v1 }
  0xe2   : > { %v887_v52 = vmax.f32 %v857_v49, 0.0  ;;  %2420 = vmatprep.subr.mxu1 %v888_v48  ;;  %v1155_v49 = vld [vmem:[%s3198_s8 + $0x18] sm:$0xff] }
  0xe3   : > { %2421 = vmatpush3.msra.mxu1 %v888_v48  ;;  %v1154_v48 = vld [vmem:[%s3198_s8 + $0x10] sm:$0xff] }
  0xe4   : > { %2422 = vmatprep.subr.mxu1 %v887_v52 }
  0xe5   : > { %2423 = vmatpush3.msra.mxu1 %v887_v52  ;;  %v1173_v52 = vpop.permute.xlu1 %1172 }
  0xe6   : > { %2424 = vmatprep.subr.mxu1 %v886_v53 }
  0xe7   : > { %2425 = vmatpush3.msra.mxu1 %v886_v53 }
  0xe8   : > { %2426 = vmatprep.subr.mxu1 %v885_v54 }
  0xe9   : > { %2427 = vmatpush3.msra.mxu1 %v885_v54  ;;  %v1163_v59 = vpop.permute.xlu1 %1162 }
  0xea   : > { %2429 = vmatmul.mubr.msk.f32.vlgmr.msra.gmra.mxu1 %vm917_vm2, %v890_v55  ;;  %v1168_v55 = vpop.permute.xlu0 %1167 }
  0xeb   : > { %2431 = vmatprep.mubr.msk.f32.mxu1 %vm917_vm2, %v891_v56 }
  0xee   : > { %2432 = vmatmul.mubr.msk.f32.gmra.mxu1 %vm917_vm2, %v892_v57 }
  0xef   : > { %2442 = vmatprep.mubr.msk.f32.mxu1 %vm917_vm2, %v1023_v58 }
 0x1aa   : > { %v2430_v4 = vpop.f32.mrf.mxu1 }
 0x1ab   : > { %v1002_v9 = vadd.f32 %v2430_v4, %v905_v3 }
 0x1ac   : > { %v996_v6 = vpop.f32.mrf.mxu1 }
 0x1ad   : > { %v997_v15 = vadd.f32 %v996_v6, %v900_v11  ;;  %v1016_v20 = vadd.f32 %v1002_v9, %v872_v12  ;;  %v1288_v9 = vld [vmem:[%s3200_s10 + $0x18] sm:$0xff]  ;;  %v1311_v11 = vpop.permute.xlu0 %1310 }
 0x1ae   : > { %v2433_v7 = vpop.f32.mrf.mxu1 }
 0x1af   : > { %v1012_v10 = vadd.f32 %v2433_v7, %v915_v60  ;;  %v1015_v23 = vadd.f32 %v997_v15, %v867_v19  ;;  %v1020_v25 = vmax.f32 %v1016_v20, 0.0  ;;  %v1286_v7 = vld [vmem:[%s3200_s10 + $0x8] sm:$0xff] }
 0x1b0   : > { %v1006_v13 = vpop.f32.mrf.mxu1 }
 0x1b1   : > { %v1018_v16 = vadd.f32 %v1012_v10, %v882_v8  ;;  %v1007_v17 = vadd.f32 %v1006_v13, %v910_v63  ;;  %v1019_v26 = vmax.f32 %v1015_v23, 0.0  ;;  %v1287_v8 = vld [vmem:[%s3200_s10 + $0x10] sm:$0xff]  ;;  %v1414_v10 = vld [vmem:[%s3202_s12] sm:$0xff]  ;;  %v1306_v13 = vpop.permute.xlu1 %1305 }
 0x1b3   : > { %v2896_v21 = vmax.f32 %v1018_v16, 0.0  ;;  %v1017_v22 = vadd.f32 %v1007_v17, %v877_v14  ;;  %v1301_v17 = vpop.permute.xlu0 %1300 }
 0x1b5   : > { %v2898_v24 = vmax.f32 %v1017_v22, 0.0  ;;  %2434 = vmatprep.subr.mxu1 %v2896_v21  ;;  %v1296_v22 = vpop.permute.xlu1 %1295 }
 0x1b6   : > { %2435 = vmatpush3.msra.mxu1 %v2896_v21 }
 0x1b7   : > { %2436 = vmatprep.subr.mxu1 %v2898_v24  ;;  %v1440_v30 = vpop.permute.xlu0 %1439 }
 0x1b8   : > { %2437 = vmatpush3.msra.mxu1 %v2898_v24 }
 0x1b9   : > { %2438 = vmatprep.subr.mxu1 %v1020_v25 }
 0x1ba   : > { %2439 = vmatpush3.msra.mxu1 %v1020_v25 }
 0x1bb   : > { %2440 = vmatprep.subr.mxu1 %v1019_v26 }
 0x1bc   : > { %2441 = vmatpush3.msra.mxu1 %v1019_v26 }
 0x1bd   : > { %2443 = vmatmul.mubr.msk.f32.vlgmr.msra.gmra.mxu1 %vm917_vm2, %v1024_v27  ;;  %v1415_v27 = vld [vmem:[%s3202_s12 + $0x8] sm:$0xff] }
 0x1be   : > { %2445 = vmatprep.mubr.msk.f32.mxu1 %vm917_vm2, %v1025_v28  ;;  %v1416_v28 = vld [vmem:[%s3202_s12 + $0x10] sm:$0xff] }
 0x1c1   : > { %2446 = vmatmul.mubr.msk.f32.gmra.mxu1 %vm917_vm2, %v1026_v29  ;;  %v1417_v29 = vld [vmem:[%s3202_s12 + $0x18] sm:$0xff] }
 0x1c2   : > { %2470 = vmatprep.mubr.msk.f32.mxu1 %vm917_vm2, %v1285_v50 }
 0x27d   : > { %v2444_v32 = vpop.f32.mrf.mxu1 }
 0x27e   : > { %v1135_v39 = vadd.f32 %v2444_v32, %v1039_v37 }
 0x27f   : > { %v1129_v34 = vpop.f32.mrf.mxu1 }
 0x280   : > { %v1130_v43 = vadd.f32 %v1129_v34, %v1034_v42  ;;  %v1149_v45 = vmax.f32 %v1135_v39, 0.0 }
 0x281   : > { %v2447_v35 = vpop.f32.mrf.mxu1 }
 0x282   : > { %v1145_v36 = vadd.f32 %v2447_v35, %v1049_v31  ;;  %v1148_v46 = vmax.f32 %v1130_v43, 0.0  ;;  %v1435_v31 = vpop.permute.xlu1 %1434  ;;  %v1548_v35 = vlaneseq }
 0x283   : > { %v1139_v38 = vpop.f32.mrf.mxu1 }
 0x284   : > { %v1151_v40 = vmax.f32 %v1145_v36, 0.0  ;;  %v1140_v41 = vadd.f32 %v1139_v38, %v1044_v33  ;;  %v1430_v33 = vpop.permute.xlu0 %1429 }
 0x286   : > { %v1150_v44 = vmax.f32 %v1140_v41, 0.0  ;;  %2448 = vmatprep.subr.mxu0 %v1151_v40  ;;  %v1425_v39 = vpop.permute.xlu1 %1424  ;;  %v1549_v41 = vand.u32 127, %v1548_v35  ;;  %v1881_v35 = vld [vmem:[%s3206_s16 + $0x28] sm:$0xff] }
 0x287   : > { %2449 = vmatpush3.msra.mxu0 %v1151_v40 }
 0x288   : > { %2450 = vmatprep.subr.mxu0 %v1150_v44  ;;  %vm1552_vm3 = vcmp.lt.s32.totalorder %v1549_v41, 16 }
 0x289   : > { %2451 = vmatpush3.msra.mxu0 %v1150_v44 }
 0x28a   : > { %2452 = vmatprep.subr.mxu0 %v1149_v45 }
 0x28b   : > { %2453 = vmatpush3.msra.mxu0 %v1149_v45 }
 0x28c   : > { %2454 = vmatprep.subr.mxu0 %v1148_v46 }
 0x28d   : > { %2455 = vmatpush3.msra.mxu0 %v1148_v46 }
 0x28e   : > { %2457 = vmatmul.mubr.msk.f32.vlgmr.msra.gmra.mxu0 %vm917_vm2, %v1153_v47 }
 0x28f   : > { %2459 = vmatprep.mubr.msk.f32.mxu0 %vm917_vm2, %v1154_v48 }
 0x292   : > { %2460 = vmatmul.mubr.msk.f32.gmra.mxu0 %vm917_vm2, %v1155_v49 }
 0x293   : > { %2484 = vmatprep.mubr.msk.f32.mxu0 %vm917_vm2, %v1414_v10  ;;  %v1599_v10 = vld [vmem:[%s3204_s14 + $0x8] sm:$0xff] }
 0x34e   : > { %v2458_v53 = vpop.f32.mrf.mxu0 }
 0x34f   : > { %v1264_v57 = vadd.f32 %v2458_v53, %v1168_v55 }
 0x350   : > { %v1258_v54 = vpop.f32.mrf.mxu0 }
 0x351   : > { %v1259_v61 = vadd.f32 %v1258_v54, %v1163_v59  ;;  %v1278_v0 = vadd.f32 %v1264_v57, %v1020_v25  ;;  %v1607_v57 = vld [vmem:[%s3205_s15] sm:$0xff] }
 0x352   : > { %v2461_v56 = vpop.f32.mrf.mxu0  ;;  %v1598_v59 = vld [vmem:[%s3204_s14] sm:$0xff] }
 0x353   : > { %v1274_v58 = vadd.f32 %v2461_v56, %v1178_v51  ;;  %v1277_v3 = vadd.f32 %v1259_v61, %v1019_v26  ;;  %v1282_v5 = vmax.f32 %v1278_v0, 0.0  ;;  %v1606_v56 = vld [vmem:[%s688_s26] sm:$0x3f]  ;;  %v1610_v61 = vld [vmem:[%s3205_s15 + $0x18] sm:$0xff]  ;;  %v1613_v0 = vld [vmem:[%s3205_s15 + $0x30] sm:$0xff] }
 0x354   : > { %v1268_v60 = vpop.f32.mrf.mxu0 }
 0x355   : > { %v1280_v62 = vadd.f32 %v1274_v58, %v2896_v21  ;;  %v1269_v63 = vadd.f32 %v1268_v60, %v1173_v52  ;;  %v1281_v6 = vmax.f32 %v1277_v3, 0.0  ;;  %v1608_v58 = vld [vmem:[%s3205_s15 + $0x8] sm:$0xff]  ;;  %v1609_v60 = vld [vmem:[%s3205_s15 + $0x10] sm:$0xff] }
 0x357   : > { %v2937_v1 = vmax.f32 %v1280_v62, 0.0  ;;  %v1279_v2 = vadd.f32 %v1269_v63, %v2898_v24  ;;  %v1611_v62 = vld [vmem:[%s3205_s15 + $0x20] sm:$0xff]  ;;  %v1612_v63 = vld [vmem:[%s3205_s15 + $0x28] sm:$0xff] }
 0x359   : > { %v2940_v4 = vmax.f32 %v1279_v2, 0.0  ;;  %2462 = vmatprep.subr.mxu1 %v2937_v1 }
 0x35a   : > { %2463 = vmatpush3.msra.mxu1 %v2937_v1 }
 0x35b   : > { %2464 = vmatprep.subr.mxu1 %v2940_v4 }
 0x35c   : > { %2465 = vmatpush3.msra.mxu1 %v2940_v4 }
 0x35d   : > { %2466 = vmatprep.subr.mxu1 %v1282_v5 }
 0x35e   : > { %2467 = vmatpush3.msra.mxu1 %v1282_v5 }
 0x35f   : > { %2468 = vmatprep.subr.mxu1 %v1281_v6 }
 0x360   : > { %2469 = vmatpush3.msra.mxu1 %v1281_v6 }
 0x361   : > { %2471 = vmatmul.mubr.msk.f32.vlgmr.msra.gmra.mxu1 %vm917_vm2, %v1286_v7  ;;  %2490 = vmatprep.subr.msk.mxu1 %vm776_vm1, %v1606_v56 }
 0x362   : > { %2473 = vmatprep.mubr.msk.f32.mxu1 %vm917_vm2, %v1287_v8  ;;  %2491 = vmatpush3.msk.msra.mxu1 %vm776_vm1, %v1606_v56 }
 0x365   : > { %2474 = vmatmul.mubr.msk.f32.gmra.mxu1 %vm917_vm2, %v1288_v9 }
 0x366   : > { %2492 = vmatprep.mubr.msk.f32.mxu1 %vm751_vm0, %v1607_v57 }
 0x369   : > { %2493 = vmatmul.mubr.msk.f32.vlgmr.msra.gmra.mxu1 %vm751_vm0, %v1608_v58 }
 0x36a   : > { %2495 = vmatprep.mubr.msk.f32.mxu1 %vm751_vm0, %v1609_v60 }
 0x36d   : > { %2496 = vmatmul.mubr.msk.f32.gmra.mxu1 %vm751_vm0, %v1610_v61 }
 0x36e   : > { %2498 = vmatprep.mubr.msk.f32.mxu1 %vm751_vm0, %v1611_v62 }
 0x371   : > { %2499 = vmatmul.mubr.msk.f32.gmra.mxu1 %vm751_vm0, %v1612_v63 }
 0x372   : > { %2501 = vmatprep.mubr.msk.f32.mxu1 %vm751_vm0, %v1613_v0 }
 0x421   : > { %v2472_v12 = vpop.f32.mrf.mxu1 }
 0x422   : > { %v1397_v19 = vadd.f32 %v2472_v12, %v1301_v17  ;;  %v1601_v12 = vld [vmem:[%s3204_s14 + $0x18] sm:$0xff]  ;;  %v1900_v17 = vld [vmem:[%s3207_s17] sm:$0xff] }
 0x423   : > { %v1391_v14 = vpop.f32.mrf.mxu1 }
 0x424   : > { %v1392_v23 = vadd.f32 %v1391_v14, %v1296_v22  ;;  %v1411_v25 = vmax.f32 %v1397_v19, 0.0  ;;  %v1603_v14 = vld [vmem:[%s3204_s14 + $0x28] sm:$0xff] }
 0x425   : > { %v2475_v15 = vpop.f32.mrf.mxu1 }
 0x426   : > { %v1407_v16 = vadd.f32 %v2475_v15, %v1311_v11  ;;  %v1410_v26 = vmax.f32 %v1392_v23, 0.0  ;;  %v1600_v11 = vld [vmem:[%s3204_s14 + $0x10] sm:$0xff] }
 0x427   : > { %v1401_v18 = vpop.f32.mrf.mxu1  ;;  %v1604_v15 = vld [vmem:[%s3204_s14 + $0x30] sm:$0xff] }
 0x428   : > { %v1413_v20 = vmax.f32 %v1407_v16, 0.0  ;;  %v1402_v21 = vadd.f32 %v1401_v18, %v1306_v13  ;;  %v1602_v13 = vld [vmem:[%s3204_s14 + $0x20] sm:$0xff]  ;;  %v1605_v16 = vld [vmem:[%s3204_s14 + $0x38] sm:$0xff] }
 0x429   : > { %v2494_v18 = vpop.f32.mrf.mxu1 }
 0x42a   : > { %v1412_v24 = vmax.f32 %v1402_v21, 0.0  ;;  %2476 = vmatprep.subr.mxu0 %v1413_v20 }
 0x42b   : > { %2477 = vmatpush3.msra.mxu0 %v1413_v20  ;;  %v1708_v19 = vpop.f32.mrf.mxu1 }
 0x42c   : > { %2478 = vmatprep.subr.mxu0 %v1412_v24 }
 0x42d   : > { %2479 = vmatpush3.msra.mxu0 %v1412_v24  ;;  %v2497_v20 = vpop.f32.mrf.mxu1 }
 0x42e   : > { %2480 = vmatprep.subr.mxu0 %v1411_v25 }
 0x42f   : > { %2481 = vmatpush3.msra.mxu0 %v1411_v25  ;;  %v1718_v21 = vpop.f32.mrf.mxu1 }
 0x430   : > { %2482 = vmatprep.subr.mxu0 %v1410_v26 }
 0x431   : > { %2483 = vmatpush3.msra.mxu0 %v1410_v26  ;;  %v2500_v24 = vpop.f32.mrf.mxu1 }
 0x432   : > { %2485 = vmatmul.mubr.msk.f32.vlgmr.msra.gmra.mxu0 %vm917_vm2, %v1415_v27 }
 0x433   : > { %2487 = vmatprep.mubr.msk.f32.mxu0 %vm917_vm2, %v1416_v28  ;;  %v1728_v27 = vpop.f32.mrf.mxu1 }
 0x436   : > { %2488 = vmatmul.mubr.msk.f32.gmra.mxu0 %vm917_vm2, %v1417_v29 }
 0x437   : > { %2512 = vmatprep.mubr.msk.f32.mxu0 %vm917_vm2, %v1598_v59  ;;  %v1876_v59 = vld [vmem:[%s3206_s16] sm:$0xff] }
 0x4f2   : > { %v2486_v32 = vpop.f32.mrf.mxu0 }
 0x4f3   : > { %v1526_v36 = vadd.f32 %v2486_v32, %v1430_v33  ;;  %v1883_v32 = vld [vmem:[%s3206_s16 + $0x38] sm:$0xff] }
 0x4f4   : > { %v1520_v34 = vpop.f32.mrf.mxu0 }
 0x4f5   : > { %v1540_v42 = vadd.f32 %v1526_v36, %v1282_v5  ;;  %v1521_v43 = vadd.f32 %v1520_v34, %v1425_v39 }
 0x4f6   : > { %v2489_v37 = vpop.f32.mrf.mxu0 }
 0x4f7   : > { %v1536_v38 = vadd.f32 %v2489_v37, %v1440_v30  ;;  %v1539_v48 = vadd.f32 %v1521_v43, %v1281_v6  ;;  %v1544_v51 = vmax.f32 %v1540_v42, 0.0  ;;  %v1880_v42 = vld [vmem:[%s3206_s16 + $0x20] sm:$0xff] }
 0x4f8   : > { %v1530_v40 = vpop.f32.mrf.mxu0 }
 0x4f9   : > { %v1542_v44 = vadd.f32 %v1536_v38, %v2937_v1  ;;  %v1531_v45 = vadd.f32 %v1530_v40, %v1435_v31  ;;  %v1554_v53 = vsel %vm1552_vm3, %v1544_v51, -inf  ;;  %v1543_v54 = vmax.f32 %v1539_v48, 0.0  ;;  %v1614_v1 = vld [vmem:[%s3205_s15 + $0x38] sm:$0xff]  ;;  %v1882_v38 = vld [vmem:[%s3206_s16 + $0x30] sm:$0xff] }
 0x4fa   : > { %2502 = vmatmul.mubr.msk.f32.gmra.mxu1 %vm751_vm0, %v1614_v1  ;;  %v1878_v51 = vld [vmem:[%s3206_s16 + $0x10] sm:$0xff] }
 0x4fb   : > { %v1541_v46 = vadd.f32 %v1531_v45, %v2940_v4  ;;  %v1546_v47 = vmax.f32 %v1542_v44, 0.0  ;;  %v1553_v55 = vsel %vm1552_vm3, %v1543_v54, -inf  ;;  %2540 = vmatprep.mubr.msk.f32.mxu1 %vm1908_vm5, %v1900_v17 }
 0x4fd   : > { %v1556_v49 = vsel %vm1552_vm3, %v1546_v47, -inf  ;;  %v1545_v50 = vmax.f32 %v1541_v46, 0.0  ;;  %v1879_v47 = vld [vmem:[%s3206_s16 + $0x18] sm:$0xff] }
 0x4fe   : > { %1563 = vmax.xlane.f32.xlu0 %v1556_v49 }
 0x4ff   : > { %v1555_v52 = vsel %vm1552_vm3, %v1545_v50, -inf }
 0x500   : > { %1561 = vmax.xlane.f32.xlu1 %v1555_v52 }
 0x502   : > { %1559 = vmax.xlane.f32.xlu0 %v1554_v53 }
 0x506   : > { %1557 = vmax.xlane.f32.xlu0 %v1553_v55  ;;  %v1877_v55 = vld [vmem:[%s3206_s16 + $0x8] sm:$0xff] }
 0x587   : > { %v1564_v2 = vpop.xlane.xlu0 %1563 }
 0x588   : > { %1573 = vst.msk [vmem:[#allocation2 + $0x18] sm:$0xff] %vm1569_vm4, %v1564_v2  ;;  %v1901_v2 = vld [vmem:[%s3207_s17 + $0x8] sm:$0xff] }
 0x589   : > { %v1562_v3 = vpop.xlane.xlu1 %1561 }
 0x58a   : > { %1572 = vst.msk [vmem:[#allocation2 + $0x10] sm:$0xff] %vm1569_vm4, %v1562_v3  ;;  %v1902_v3 = vld [vmem:[%s3207_s17 + $0x10] sm:$0xff] }
 0x58b   : > { %v1560_v4 = vpop.xlane.xlu0 %1559 }
 0x58c   : > { %1571 = vst.msk [vmem:[#allocation2 + $0x8] sm:$0xff] %vm1569_vm4, %v1560_v4  ;;  %v1903_v4 = vld [vmem:[%s3207_s17 + $0x18] sm:$0xff] }
 0x58f   : > { %v1558_v5 = vpop.xlane.xlu0 %1557  ;;  %v1597_v6 = vld [vmem:[#allocation2 + $0x18] sm:$0xff] }
 0x590   : > { %1570 = vst.msk [vmem:[#allocation2] sm:$0xff] %vm1569_vm4, %v1558_v5  ;;  %2504 = vmatprep.subr.mxu0 %v1597_v6  ;;  %v2010_v5 = vld [vmem:[%s3209_s19] sm:$0xff] }
 0x591   : > { %2505 = vmatpush3.msra.mxu0 %v1597_v6  ;;  %v1596_v7 = vld [vmem:[#allocation2 + $0x10] sm:$0xff] }
 0x592   : > { %2506 = vmatprep.subr.mxu0 %v1596_v7 }
 0x593   : > { %2507 = vmatpush3.msra.mxu0 %v1596_v7  ;;  %v1595_v8 = vld [vmem:[#allocation2 + $0x8] sm:$0xff] }
 0x594   : > { %2508 = vmatprep.subr.mxu0 %v1595_v8 }
 0x595   : > { %2509 = vmatpush3.msra.mxu0 %v1595_v8  ;;  %v1907_v8 = vld [vmem:[%s3208_s18 + $0x18] sm:$0xff] }
 0x597   : > { %v1594_v9 = vld [vmem:[#allocation2] sm:$0xff] }
 0x598   : > { %2510 = vmatprep.subr.mxu0 %v1594_v9 }
 0x599   : > { %2511 = vmatpush3.msra.mxu0 %v1594_v9  ;;  %v1905_v9 = vld [vmem:[%s3208_s18 + $0x8] sm:$0xff] }
 0x59a   : > { %2513 = vmatmul.mubr.msk.f32.vlgmr.msra.gmra.mxu0 %vm917_vm2, %v1599_v10 }
 0x59b   : > { %2515 = vmatprep.mubr.msk.f32.mxu0 %vm917_vm2, %v1600_v11  ;;  %v1906_v11 = vld [vmem:[%s3208_s18 + $0x10] sm:$0xff] }
 0x59e   : > { %2516 = vmatmul.mubr.msk.f32.gmra.mxu0 %vm917_vm2, %v1601_v12 }
 0x59f   : > { %2518 = vmatprep.mubr.msk.f32.mxu0 %vm917_vm2, %v1602_v13  ;;  %v1904_v13 = vld [vmem:[%s3208_s18] sm:$0xff] }
 0x5a2   : > { %2519 = vmatmul.mubr.msk.f32.gmra.mxu0 %vm917_vm2, %v1603_v14 }
 0x5a3   : > { %2521 = vmatprep.mubr.msk.f32.mxu0 %vm917_vm2, %v1604_v15 }
 0x5a6   : > { %2522 = vmatmul.mubr.msk.f32.gmra.mxu0 %vm917_vm2, %v1605_v16 }
 0x5a7   : > { %2554 = vmatprep.mubr.msk.f32.mxu0 %vm917_vm2, %v2010_v5 }
 0x5ba   : > { %v2503_v29 = vpop.f32.mrf.mxu1 }
 0x5bc   : > { %v1738_v36 = vpop.f32.mrf.mxu1 }
 0x65a   : > { %v2514_v22 = vpop.f32.mrf.mxu0 }
 0x65b   : > { %v1843_v52 = vadd.f32 %v2514_v22, %v2494_v18  ;;  %v2011_v22 = vld [vmem:[%s3209_s19 + $0x8] sm:$0xff] }
 0x65c   : > { %v1837_v23 = vpop.f32.mrf.mxu0 }
 0x65d   : > { %v1838_v56 = vadd.f32 %v1837_v23, %v1708_v19  ;;  %v1885_v60 = vadd.f32 %v1877_v55, %v1843_v52  ;;  %v2012_v23 = vld [vmem:[%s3209_s19 + $0x10] sm:$0xff] }
 0x65e   : > { %v2517_v25 = vpop.f32.mrf.mxu0 }
 0x65f   : > { %v1853_v43 = vadd.f32 %v2517_v25, %v2497_v20  ;;  %v1884_v62 = vadd.f32 %v1876_v59, %v1838_v56  ;;  %v1893_v0 = vmax.f32 %v1885_v60, 0.0  ;;  %v2014_v25 = vld [vmem:[%s3209_s19 + $0x20] sm:$0xff] }
 0x660   : > { %v1847_v26 = vpop.f32.mrf.mxu0 }
 0x661   : > { %v1848_v48 = vadd.f32 %v1847_v26, %v1718_v21  ;;  %v1887_v53 = vadd.f32 %v1879_v47, %v1853_v43  ;;  %v1892_v1 = vmax.f32 %v1884_v62, 0.0  ;;  %v2015_v26 = vld [vmem:[%s3209_s19 + $0x28] sm:$0xff]  ;;  %v2022_v43 = vld [vmem:[%s3210_s20 + $0x20] sm:$0xff] }
 0x662   : > { %v2520_v28 = vpop.f32.mrf.mxu0 }
 0x663   : > { %v1863_v33 = vadd.f32 %v2520_v28, %v2500_v24  ;;  %v1886_v57 = vadd.f32 %v1878_v51, %v1848_v48  ;;  %v1895_v61 = vmax.f32 %v1887_v53, 0.0  ;;  %v2013_v24 = vld [vmem:[%s3209_s19 + $0x18] sm:$0xff] }
 0x664   : > { %v1857_v30 = vpop.f32.mrf.mxu0  ;;  %v2017_v28 = vld [vmem:[%s3209_s19 + $0x38] sm:$0xff] }
 0x665   : > { %v1858_v39 = vadd.f32 %v1857_v30, %v1728_v27  ;;  %v1889_v44 = vadd.f32 %v1881_v35, %v1863_v33  ;;  %v1894_v63 = vmax.f32 %v1886_v57, 0.0  ;;  %v2016_v27 = vld [vmem:[%s3209_s19 + $0x30] sm:$0xff] }
 0x666   : > { %v2523_v31 = vpop.f32.mrf.mxu0 }
 0x667   : > { %v1873_v34 = vadd.f32 %v2523_v31, %v2503_v29  ;;  %v1888_v49 = vadd.f32 %v1880_v42, %v1858_v39  ;;  %v1897_v54 = vmax.f32 %v1889_v44, 0.0  ;;  %v2019_v29 = vld [vmem:[%s3210_s20 + $0x8] sm:$0xff]  ;;  %v2018_v31 = vld [vmem:[%s3210_s20] sm:$0xff] }
 0x668   : > { %v1867_v37 = vpop.f32.mrf.mxu0 }
 0x669   : > { %v1891_v40 = vadd.f32 %v1883_v32, %v1873_v34  ;;  %v1868_v41 = vadd.f32 %v1867_v37, %v1738_v36  ;;  %v1896_v58 = vmax.f32 %v1888_v49, 0.0  ;;  %v2021_v34 = vld [vmem:[%s3210_s20 + $0x18] sm:$0xff]  ;;  %v2020_v37 = vld [vmem:[%s3210_s20 + $0x10] sm:$0xff] }
 0x66a   : > { %v2024_v49 = vld [vmem:[%s3210_s20 + $0x30] sm:$0xff] }
 0x66b   : > { %v1899_v45 = vmax.f32 %v1891_v40, 0.0  ;;  %v1890_v46 = vadd.f32 %v1882_v38, %v1868_v41  ;;  %v2023_v40 = vld [vmem:[%s3210_s20 + $0x28] sm:$0xff] }
 0x66d   : > { %v1898_v50 = vmax.f32 %v1890_v46, 0.0  ;;  %2524 = vmatprep.subr.mxu1 %v1899_v45  ;;  %v2025_v46 = vld [vmem:[%s3210_s20 + $0x38] sm:$0xff] }
 0x66e   : > { %2525 = vmatpush3.msra.mxu1 %v1899_v45 }
 0x66f   : > { %2526 = vmatprep.subr.mxu1 %v1898_v50 }
 0x670   : > { %2527 = vmatpush3.msra.mxu1 %v1898_v50 }
 0x671   : > { %2528 = vmatprep.subr.mxu1 %v1897_v54 }
 0x672   : > { %2529 = vmatpush3.msra.mxu1 %v1897_v54 }
 0x673   : > { %2530 = vmatprep.subr.mxu1 %v1896_v58 }
 0x674   : > { %2531 = vmatpush3.msra.mxu1 %v1896_v58 }
 0x675   : > { %2532 = vmatprep.subr.mxu1 %v1895_v61 }
 0x676   : > { %2533 = vmatpush3.msra.mxu1 %v1895_v61 }
 0x677   : > { %2534 = vmatprep.subr.mxu1 %v1894_v63 }
 0x678   : > { %2535 = vmatpush3.msra.mxu1 %v1894_v63 }
 0x679   : > { %2536 = vmatprep.subr.mxu1 %v1893_v0 }
 0x67a   : > { %2537 = vmatpush3.msra.mxu1 %v1893_v0 }
 0x67b   : > { %2538 = vmatprep.subr.mxu1 %v1892_v1 }
 0x67c   : > { %2539 = vmatpush3.msra.mxu1 %v1892_v1 }
 0x67d   : > { %2541 = vmatmul.mubr.msk.f32.vlgmr.msra.gmra.mxu1 %vm1908_vm5, %v1901_v2 }
 0x67e   : > { %2543 = vmatprep.mubr.msk.f32.mxu1 %vm1908_vm5, %v1902_v3 }
 0x681   : > { %2544 = vmatmul.mubr.msk.f32.gmra.mxu1 %vm1908_vm5, %v1903_v4 }
 0x73d   : > { %v2542_v6 = vpop.f32.mrf.mxu1 }
 0x73e   : > { %v1993_v15 = vadd.f32 %v2542_v6, %v1905_v9 }
 0x73f   : > { %v1987_v7 = vpop.f32.mrf.mxu1 }
 0x740   : > { %v1988_v18 = vadd.f32 %v1987_v7, %v1904_v13  ;;  %v2007_v20 = vmax.f32 %v1993_v15, 0.0 }
 0x741   : > { %v2545_v10 = vpop.f32.mrf.mxu1 }
 0x742   : > { %v2003_v12 = vadd.f32 %v2545_v10, %v1907_v8  ;;  %v2006_v21 = vmax.f32 %v1988_v18, 0.0 }
 0x743   : > { %v1997_v14 = vpop.f32.mrf.mxu1 }
 0x744   : > { %v2009_v16 = vmax.f32 %v2003_v12, 0.0  ;;  %v1998_v17 = vadd.f32 %v1997_v14, %v1906_v11 }
 0x746   : > { %v2008_v19 = vmax.f32 %v1998_v17, 0.0  ;;  %2546 = vmatprep.subr.mxu0 %v2009_v16 }
 0x747   : > { %2547 = vmatpush3.msra.mxu0 %v2009_v16 }
 0x748   : > { %2548 = vmatprep.subr.mxu0 %v2008_v19 }
 0x749   : > { %2549 = vmatpush3.msra.mxu0 %v2008_v19 }
 0x74a   : > { %2550 = vmatprep.subr.mxu0 %v2007_v20 }
 0x74b   : > { %2551 = vmatpush3.msra.mxu0 %v2007_v20 }
 0x74c   : > { %2552 = vmatprep.subr.mxu0 %v2006_v21 }
 0x74d   : > { %2553 = vmatpush3.msra.mxu0 %v2006_v21 }
 0x74e   : > { %2555 = vmatmul.mubr.msk.f32.vlgmr.msra.gmra.mxu0 %vm917_vm2, %v2011_v22 }
 0x74f   : > { %2557 = vmatprep.mubr.msk.f32.mxu0 %vm917_vm2, %v2012_v23 }
 0x752   : > { %2558 = vmatmul.mubr.msk.f32.gmra.mxu0 %vm917_vm2, %v2013_v24 }
 0x753   : > { %2560 = vmatprep.mubr.msk.f32.mxu0 %vm917_vm2, %v2014_v25 }
 0x756   : > { %2561 = vmatmul.mubr.msk.f32.gmra.mxu0 %vm917_vm2, %v2015_v26 }
 0x757   : > { %2563 = vmatprep.mubr.msk.f32.mxu0 %vm917_vm2, %v2016_v27 }
 0x75a   : > { %2564 = vmatmul.mubr.msk.f32.gmra.mxu0 %vm917_vm2, %v2017_v28 }
 0x80e   : > { %v2556_v30 = vpop.f32.mrf.mxu0 }
 0x80f   : > { %v2122_v32 = vadd.f32 %v2556_v30, %v2019_v29 }
 0x810   : > { %v2116_v33 = vpop.f32.mrf.mxu0 }
 0x811   : > { %2157 = vst.msk [vmem:[%s3142_s25 + $0x8] sm:$0xff] %vm1569_vm4, %v2122_v32  ;;  %v2117_v35 = vadd.f32 %v2116_v33, %v2018_v31 }
 0x812   : > { %v2559_v36 = vpop.f32.mrf.mxu0 }
 0x813   : > { %2156 = vst.msk [vmem:[%s3142_s25] sm:$0xff] %vm1569_vm4, %v2117_v35  ;;  %v2132_v38 = vadd.f32 %v2559_v36, %v2021_v34 }
 0x814   : > { %v2126_v39 = vpop.f32.mrf.mxu0 }
 0x815   : > { %2159 = vst.msk [vmem:[%s3142_s25 + $0x18] sm:$0xff] %vm1569_vm4, %v2132_v38  ;;  %v2127_v41 = vadd.f32 %v2126_v39, %v2020_v37 }
 0x816   : > { %v2562_v42 = vpop.f32.mrf.mxu0 }
 0x817   : > { %2158 = vst.msk [vmem:[%s3142_s25 + $0x10] sm:$0xff] %vm1569_vm4, %v2127_v41  ;;  %v2142_v44 = vadd.f32 %v2562_v42, %v2023_v40 }
 0x818   : > { %v2136_v45 = vpop.f32.mrf.mxu0 }
 0x819   : > { %2161 = vst.msk [vmem:[%s3142_s25 + $0x28] sm:$0xff] %vm1569_vm4, %v2142_v44  ;;  %v2137_v47 = vadd.f32 %v2136_v45, %v2022_v43 }
 0x81a   : > { %v2565_v48 = vpop.f32.mrf.mxu0 }
 0x81b   : > { %2160 = vst.msk [vmem:[%s3142_s25 + $0x20] sm:$0xff] %vm1569_vm4, %v2137_v47  ;;  %v2152_v50 = vadd.f32 %v2565_v48, %v2025_v46 }
 0x81c   : > { %v2146_v51 = vpop.f32.mrf.mxu0 }
 0x81d   : > { %2163 = vst.msk [vmem:[%s3142_s25 + $0x38] sm:$0xff] %vm1569_vm4, %v2152_v50  ;;  %v2147_v52 = vadd.f32 %v2146_v51, %v2024_v49 }
 0x81f   : > { %2162 = vst.msk [vmem:[%s3142_s25 + $0x30] sm:$0xff] %vm1569_vm4, %v2147_v52 }
 0x820 PF: > { %s3233_s26 = sld [smem:[#allocation4_spill]] }
 0x821   : > { %s3234_s2 = sld [smem:[#allocation3_spill]] }
 0x822   : > { %s3235_s25 = sld [smem:[#allocation5_spill]] }
 0x826   : > { %s31_s26 = sadd.s32 1, %s3233_s26  }
 0x827   : > { %p28_p5 = scmp.ge.s32.totalorder %s31_s26, 4  }
 0x829   :  { %30 = sbr.rel (!%p28_p5) target bundleno = 7 (0x7), region = 149 }

</bundles_post_ra>
